<compile_context>
chip_gen: v7x
topology: tpu7x:2x2x1
jax: 0.10.0
libtpu: 0.0.40
codegen_flags: <defaults>
</compile_context>

<pallas_src>
import functools

import jax
import jax.numpy as jnp
from jax.experimental import pallas as pl
from jax.experimental.pallas import tpu as pltpu


def _pad128(n):
    return ((n + 127) // 128) * 128


# --------------------------------------------------------------------------
# Fused whole-model kernel:
#   per (batch_block, layer):  LN -> attn -> +res -> LN -> MLP -> +res
#   at the last layer:         final LayerNorm written to the output block
# --------------------------------------------------------------------------
def llama_model_kernel(x_ref, probs_ref, mask_ref,
                       ln1w_ref, ln1b_ref, wv1_ref, wv2_ref, wo1_ref, wo2_ref,
                       ln2w_ref, ln2b_ref, wg1_ref, wg2_ref, wu1_ref, wu2_ref,
                       wd1_ref, wd2_ref, normw_ref, normb_ref,
                       out_ref, *, eps, hidden, batch_per_block, seq):
    l = pl.program_id(1)                     # layer axis (inner, "arbitrary")
    n_layers = pl.num_programs(1)
    f32 = jnp.float32
    bf16 = jnp.bfloat16

    # The activation lives in the output block (constant index map along the
    # layer axis -> held in VMEM across layers). Initialise it from x once per
    # batch block, strictly before any read of out_ref.
    @pl.when(l == 0)
    def _():
        out_ref[...] = x_ref[...]

    x = out_ref[...]                          # (Mb, HP) f32, padded lanes are 0
    mask = mask_ref[...]                      # (1, HP): 1 on real lanes, 0 padded
    inv_h = 1.0 / hidden

    def layernorm(h, w, b):
        # Padded lanes of h are zero by construction -> unmasked mean is exact.
        mu = jnp.sum(h, axis=-1, keepdims=True) * inv_h
        d = (h - mu) * mask                   # single mask multiply per LN
        var = jnp.sum(d * d, axis=-1, keepdims=True) * inv_h
        # padded lanes of w/b are zero -> padded lanes of the output stay zero.
        return d * jax.lax.rsqrt(var + eps) * w + b

    def factored(h_bf16, w1_ref, w2_ref):
        # FactorizedLinear kept as two chained MXU matmuls (low-rank form).
        t = jnp.dot(h_bf16, w1_ref[0], preferred_element_type=f32)
        return jnp.dot(t.astype(bf16), w2_ref[0], preferred_element_type=f32)

    # ---- self-attention branch ----
    h1 = layernorm(x, ln1w_ref[0], ln1b_ref[0])
    v = factored(h1.astype(bf16), wv1_ref, wv2_ref)          # (Mb, HKP) f32
    hkp = v.shape[-1]
    vb = v.reshape(batch_per_block, seq, hkp).astype(bf16)   # (Bb, S, HKP)
    pb = jnp.broadcast_to(probs_ref[...], (batch_per_block, seq, seq))  # bf16
    attn = jnp.einsum('bqk,bkh->bqh', pb, vb,
                      preferred_element_type=f32)            # batched matmul
    attn = attn.reshape(batch_per_block * seq, hkp).astype(bf16)
    o = factored(attn, wo1_ref, wo2_ref)                     # (Mb, HP) f32
    x = x + o

    # ---- MLP branch ----
    h2 = layernorm(x, ln2w_ref[0], ln2b_ref[0])
    g = factored(h2.astype(bf16), wg1_ref, wg2_ref)          # (Mb, IP) f32
    g = g * jax.nn.sigmoid(g)                                 # SiLU in f32
    u = factored(g.astype(bf16), wu1_ref, wu2_ref)           # (Mb, IP)
    d = factored(u.astype(bf16), wd1_ref, wd2_ref)           # (Mb, HP)
    x = x + d

    @pl.when(l < n_layers - 1)
    def _():
        out_ref[...] = x                                      # carry to next layer

    @pl.when(l == n_layers - 1)
    def _():
        out_ref[...] = layernorm(x, normw_ref[...], normb_ref[...])


# --------------------------------------------------------------------------
# Glue: rope table, params, kernel-side parameter prep, model driver
# --------------------------------------------------------------------------
def rope_table(seq_len, dim, theta=10000.0):
    pos = jnp.arange(seq_len, dtype=jnp.float32)
    freqs = theta ** (-jnp.arange(0, dim, 2, dtype=jnp.float32) / dim)
    ang = pos[:, None] * freqs[None, :]                            # (S, dim//2)
    return jnp.concatenate([jnp.sin(ang), jnp.cos(ang)], axis=-1)  # (S, dim)


def init_params(key, cfg, rank):
    # Factored weights mirroring the PyTorch module structure, stored (in, out).
    H, I = cfg['hidden_size'], cfg['intermediate_size']
    V, L = cfg['vocab_size'], cfg['num_hidden_layers']
    Hk = H // 3
    keys = jax.random.split(key, 2 + L)

    def w(k, shape, scale=0.05):
        return scale * jax.random.normal(k, shape, jnp.float32)

    params = {'emb': w(keys[0], (V, H))}
    layers = []
    for li in range(L):
        ks = jax.random.split(keys[2 + li], 14)
        layers.append({
            'ln1_w': jnp.ones((1, H), jnp.float32) + 0.1 * jax.random.normal(ks[0], (1, H)),
            'ln1_b': 0.1 * jax.random.normal(ks[1], (1, H)),
            'wv1': w(ks[2], (H, rank)),  'wv2': w(ks[3], (rank, Hk)),
            'wo1': w(ks[4], (Hk, rank)), 'wo2': w(ks[5], (rank, H)),
            'ln2_w': jnp.ones((1, H), jnp.float32) + 0.1 * jax.random.normal(ks[6], (1, H)),
            'ln2_b': 0.1 * jax.random.normal(ks[7], (1, H)),
            'wg1': w(ks[8], (H, rank)),  'wg2': w(ks[9], (rank, I)),
            'wu1': w(ks[10], (I, rank)), 'wu2': w(ks[11], (rank, I)),
            'wd1': w(ks[12], (I, rank)), 'wd2': w(ks[13], (rank, H)),
            # q_proj / k_proj exist in the PyTorch module but their outputs are
            # discarded by LlamaRotaryEmbedding -> not materialized.
        })
    params['layers'] = layers
    kf = jax.random.split(keys[1], 2)
    params['norm_w'] = jnp.ones((1, H), jnp.float32) + 0.1 * jax.random.normal(kf[0], (1, H))
    params['norm_b'] = 0.1 * jax.random.normal(kf[1], (1, H))
    return params


def prepare_kernel_params(params, cfg, rank):
    """Keep the rank factorization; zero-pad every factor to lane-dense
    128-multiples, cast to bf16, and stack per-layer weights along a leading
    layer axis so they pipeline under compute."""
    H, I = cfg['hidden_size'], cfg['intermediate_size']
    Hk = H // 3
    HP, HKP, IP, RP = _pad128(H), _pad128(Hk), _pad128(I), _pad128(rank)

    def pad_w(m, rows, cols):
        out = jnp.zeros((rows, cols), jnp.float32).at[:m.shape[0], :m.shape[1]].set(m)
        return out.astype(jnp.bfloat16)

    def pad_vec(v, cols):
        return jnp.zeros((1, cols), jnp.float32).at[:, :v.shape[-1]].set(v)

    layers = params['layers']
    stack = lambda f: jnp.stack([f(Lr) for Lr in layers])
    return {
        'HP': HP, 'HKP': HKP, 'IP': IP, 'RP': RP,
        'ln1_w': stack(lambda Lr: pad_vec(Lr['ln1_w'], HP)),   # (L,1,HP) f32
        'ln1_b': stack(lambda Lr: pad_vec(Lr['ln1_b'], HP)),
        'ln2_w': stack(lambda Lr: pad_vec(Lr['ln2_w'], HP)),
        'ln2_b': stack(lambda Lr: pad_vec(Lr['ln2_b'], HP)),
        'wv1': stack(lambda Lr: pad_w(Lr['wv1'], HP, RP)),     # factored, bf16
        'wv2': stack(lambda Lr: pad_w(Lr['wv2'], RP, HKP)),
        'wo1': stack(lambda Lr: pad_w(Lr['wo1'], HKP, RP)),
        'wo2': stack(lambda Lr: pad_w(Lr['wo2'], RP, HP)),
        'wg1': stack(lambda Lr: pad_w(Lr['wg1'], HP, RP)),
        'wg2': stack(lambda Lr: pad_w(Lr['wg2'], RP, IP)),
        'wu1': stack(lambda Lr: pad_w(Lr['wu1'], IP, RP)),
        'wu2': stack(lambda Lr: pad_w(Lr['wu2'], RP, IP)),
        'wd1': stack(lambda Lr: pad_w(Lr['wd1'], IP, RP)),
        'wd2': stack(lambda Lr: pad_w(Lr['wd2'], RP, HP)),
        'norm_w': pad_vec(params['norm_w'], HP),
        'norm_b': pad_vec(params['norm_b'], HP),
        'mask': (jnp.arange(HP)[None, :] < H).astype(jnp.float32),   # (1,HP)
    }


def _block_spec(shape, index_map, *, fetch_once=False):
    """Constant-index blocks request single-buffering so the pipeline does not
    silently double their VMEM footprint; fall back gracefully if the installed
    jax does not expose pipeline_mode/Buffered."""
    if fetch_once:
        try:
            return pl.BlockSpec(shape, index_map, pipeline_mode=pl.Buffered(1))
        except (TypeError, AttributeError):
            pass
    return pl.BlockSpec(shape, index_map)


def llama_forward_pallas(params, input_ids, cfg, *, batch_blocks=1):
    H = cfg['hidden_size']
    eps = cfg['rms_norm_eps']
    L = cfg['num_hidden_layers']
    B, S = input_ids.shape
    assert B % batch_blocks == 0
    Bb = B // batch_blocks                  # batch elements per grid block
    kp = params['kernel']
    HP, HKP, IP, RP = kp['HP'], kp['HKP'], kp['IP'], kp['RP']
    M = B * S
    Mb = Bb * S

    # TODO(synk): embedding gather kept in plain JAX (data-dependent row gather).
    x = params['emb'][input_ids].reshape(M, H)
    x = jnp.zeros((M, HP), jnp.float32).at[:, :H].set(x)

    # Batch- and layer-invariant attention probabilities, hoisted out of the
    # kernel and cast to bf16 once.
    rope = rope_table(S, H)
    probs = jax.nn.softmax(rope @ rope.T, axis=-1).astype(jnp.bfloat16)   # (S,S)

    def act_map(b, l):
        return (b, 0)

    def const_spec(shape):
        return _block_spec(shape, lambda b, l, _n=len(shape): (0,) * _n,
                           fetch_once=True)

    def layer_spec(shape):
        return pl.BlockSpec(shape, lambda b, l, _n=len(shape): (l,) + (0,) * (_n - 1))

    in_specs = [
        pl.BlockSpec((Mb, HP), act_map),    # x (read once per batch block)
        const_spec((S, S)),                 # probs, bf16, resident once
        const_spec((1, HP)),                # lane mask for LayerNorm
        layer_spec((1, 1, HP)),             # ln1_w
        layer_spec((1, 1, HP)),             # ln1_b
        layer_spec((1, HP, RP)),            # wv1 (factored)
        layer_spec((1, RP, HKP)),           # wv2
        layer_spec((1, HKP, RP)),           # wo1
        layer_spec((1, RP, HP)),            # wo2
        layer_spec((1, 1, HP)),             # ln2_w
        layer_spec((1, 1, HP)),             # ln2_b
        layer_spec((1, HP, RP)),            # wg1
        layer_spec((1, RP, IP)),            # wg2
        layer_spec((1, IP, RP)),            # wu1
        layer_spec((1, RP, IP)),            # wu2
        layer_spec((1, IP, RP)),            # wd1
        layer_spec((1, RP, HP)),            # wd2
        const_spec((1, HP)),                # final norm_w
        const_spec((1, HP)),                # final norm_b
    ]

    # VMEM budget: resident activation blocks + constants + double-buffered
    # per-layer weight set + headroom for kernel intermediates.  Capped at
    # 64 MiB so the limit is valid on v7x as well as v5e/v6e.
    wset_bytes = 2 * (2 * HP * RP + RP * HKP + HKP * RP + 2 * RP * HP
                      + RP * IP + 2 * IP * RP + RP * IP) + 4 * 4 * HP
    budget = (4 * Mb * HP * 4                # x + out blocks (f32), buffered
              + S * S * 2 + 3 * HP * 4       # probs, mask, norm vecs
              + 2 * wset_bytes               # double-buffered layer weights
              + 8 * Mb * max(HP, IP) * 4)    # headroom for intermediates
    vmem_limit = int(min(64 * 1024 * 1024, max(32 * 1024 * 1024, budget)))

    grid_spec = pltpu.PrefetchScalarGridSpec(
        num_scalar_prefetch=0,
        grid=(batch_blocks, L),              # batch blocks (parallel) x layers
        in_specs=in_specs,
        out_specs=pl.BlockSpec((Mb, HP), act_map),
    )

    out = pl.pallas_call(
        functools.partial(llama_model_kernel, eps=eps, hidden=H,
                          batch_per_block=Bb, seq=S),
        out_shape=jax.ShapeDtypeStruct((M, HP), jnp.float32),
        grid_spec=grid_spec,
        compiler_params=pltpu.CompilerParams(
            dimension_semantics=("parallel", "arbitrary"),
            vmem_limit_bytes=vmem_limit),
    )(x, probs, kp['mask'],
      kp['ln1_w'], kp['ln1_b'], kp['wv1'], kp['wv2'], kp['wo1'], kp['wo2'],
      kp['ln2_w'], kp['ln2_b'], kp['wg1'], kp['wg2'], kp['wu1'], kp['wu2'],
      kp['wd1'], kp['wd2'], kp['norm_w'], kp['norm_b'])

    return out[:, :H].reshape(B, S, H)


# --------------------------------------------------------------------------
# Pure-JAX reference (f32, original factored weights) for sanity-checking
# --------------------------------------------------------------------------
def llama_forward_ref(params, input_ids, cfg):
    eps = cfg['rms_norm_eps']
    H = cfg['hidden_size']
    _, S = input_ids.shape
    x = params['emb'][input_ids]
    rope = rope_table(S, H)
    probs = jax.nn.softmax(rope @ rope.T, axis=-1)

    def ln(h, w, b):
        mu = jnp.mean(h, axis=-1, keepdims=True)
        var = jnp.mean((h - mu) ** 2, axis=-1, keepdims=True)
        return (h - mu) / jnp.sqrt(var + eps) * w + b

    for Lr in params['layers']:
        h = ln(x, Lr['ln1_w'], Lr['ln1_b'])
        v = h @ Lr['wv1'] @ Lr['wv2']
        attn = jnp.einsum('qk,bkh->bqh', probs, v)
        x = x + attn @ Lr['wo1'] @ Lr['wo2']
        h2 = ln(x, Lr['ln2_w'], Lr['ln2_b'])
        g = h2 @ Lr['wg1'] @ Lr['wg2']
        g = g * jax.nn.sigmoid(g)
        u = g @ Lr['wu1'] @ Lr['wu2']
        x = x + u @ Lr['wd1'] @ Lr['wd2']
    return ln(x, params['norm_w'], params['norm_b'])


if __name__ == "__main__":
    cfg = dict(hidden_size=48, intermediate_size=64, vocab_size=128,
               num_hidden_layers=2, rms_norm_eps=1e-5)
    rank = 16     # spec uses rank=242; kept small for the toy config
    B, S = 2, 16  # S multiple of 16 keeps bf16 row tiles sublane-aligned

    key = jax.random.PRNGKey(0)
    kparams, kid = jax.random.split(key)
    params = init_params(kparams, cfg, rank)
    params['kernel'] = prepare_kernel_params(params, cfg, rank)
    input_ids = jax.random.randint(kid, (B, S), 0, cfg['vocab_size'])

    out = llama_forward_pallas(params, input_ids, cfg, batch_blocks=2)
    out = jax.block_until_ready(out)

    ref = llama_forward_ref(params, input_ids, cfg)
    assert out.shape == (B, S, cfg['hidden_size'])
    assert bool(jnp.all(jnp.isfinite(out)))
    max_err = float(jnp.max(jnp.abs(out - ref)))
    assert bool(jnp.allclose(out, ref, rtol=5e-2, atol=5e-2)), max_err

    print("KERNEL_OK")
</pallas_src>

<mosaic_0001>
module attributes {stable_mosaic.version = 11 : i64} {
  func.func @llama_model_kernel(%arg0: i32, %arg1: i32, %arg2: memref<16x128xf32, #tpu.memory_space<vmem>>, %arg3: memref<16x16xbf16, #tpu.memory_space<vmem>>, %arg4: memref<1x128xf32, #tpu.memory_space<vmem>>, %arg5: memref<1x1x128xf32, #tpu.memory_space<vmem>>, %arg6: memref<1x1x128xf32, #tpu.memory_space<vmem>>, %arg7: memref<1x128x128xbf16, #tpu.memory_space<vmem>>, %arg8: memref<1x128x128xbf16, #tpu.memory_space<vmem>>, %arg9: memref<1x128x128xbf16, #tpu.memory_space<vmem>>, %arg10: memref<1x128x128xbf16, #tpu.memory_space<vmem>>, %arg11: memref<1x1x128xf32, #tpu.memory_space<vmem>>, %arg12: memref<1x1x128xf32, #tpu.memory_space<vmem>>, %arg13: memref<1x128x128xbf16, #tpu.memory_space<vmem>>, %arg14: memref<1x128x128xbf16, #tpu.memory_space<vmem>>, %arg15: memref<1x128x128xbf16, #tpu.memory_space<vmem>>, %arg16: memref<1x128x128xbf16, #tpu.memory_space<vmem>>, %arg17: memref<1x128x128xbf16, #tpu.memory_space<vmem>>, %arg18: memref<1x128x128xbf16, #tpu.memory_space<vmem>>, %arg19: memref<1x128xf32, #tpu.memory_space<vmem>>, %arg20: memref<1x128xf32, #tpu.memory_space<vmem>>, %arg21: memref<16x128xf32, #tpu.memory_space<vmem>>) attributes {dimension_semantics = [#tpu.dimension_semantics<parallel>, #tpu.dimension_semantics<arbitrary>], iteration_bounds = array<i64: 2, 2>, scalar_prefetch = 0 : i64, scratch_operands = 0 : i64, tpu.core_type = #tpu.core_type<tc>, window_params = [{transform_indices = @transform_0, window_bounds = array<i64: 16, 128>}, {pipeline_mode = #tpu.pipeline_mode<synchronous>, transform_indices = @transform_1, window_bounds = array<i64: 16, 16>}, {pipeline_mode = #tpu.pipeline_mode<synchronous>, transform_indices = @transform_2, window_bounds = array<i64: 1, 128>}, {transform_indices = @transform_3, window_bounds = array<i64: 1, 1, 128>}, {transform_indices = @transform_4, window_bounds = array<i64: 1, 1, 128>}, {transform_indices = @transform_5, window_bounds = array<i64: 1, 128, 128>}, {transform_indices = @transform_6, window_bounds = array<i64: 1, 128, 128>}, {transform_indices = @transform_7, window_bounds = array<i64: 1, 128, 128>}, {transform_indices = @transform_8, window_bounds = array<i64: 1, 128, 128>}, {transform_indices = @transform_9, window_bounds = array<i64: 1, 1, 128>}, {transform_indices = @transform_10, window_bounds = array<i64: 1, 1, 128>}, {transform_indices = @transform_11, window_bounds = array<i64: 1, 128, 128>}, {transform_indices = @transform_12, window_bounds = array<i64: 1, 128, 128>}, {transform_indices = @transform_13, window_bounds = array<i64: 1, 128, 128>}, {transform_indices = @transform_14, window_bounds = array<i64: 1, 128, 128>}, {transform_indices = @transform_15, window_bounds = array<i64: 1, 128, 128>}, {transform_indices = @transform_16, window_bounds = array<i64: 1, 128, 128>}, {pipeline_mode = #tpu.pipeline_mode<synchronous>, transform_indices = @transform_17, window_bounds = array<i64: 1, 128>}, {pipeline_mode = #tpu.pipeline_mode<synchronous>, transform_indices = @transform_18, window_bounds = array<i64: 1, 128>}, {transform_indices = @transform_19, window_bounds = array<i64: 16, 128>}]} {
    %c0_i32 = arith.constant 0 : i32
    %0 = arith.cmpi eq, %arg1, %c0_i32 : i32
    %1 = arith.extui %0 : i1 to i32
    %c0_i32_0 = arith.constant 0 : i32
    %2 = arith.cmpi ne, %1, %c0_i32_0 : i32
    scf.if %2 {
      %c0_72 = arith.constant 0 : index
      %c0_73 = arith.constant 0 : index
      %117 = vector.load %arg2[%c0_72, %c0_73] : memref<16x128xf32, #tpu.memory_space<vmem>>, vector<16x128xf32>
      %c0_74 = arith.constant 0 : index
      %c0_75 = arith.constant 0 : index
      %118 = vector.load %arg21[%c0_74, %c0_75] : memref<16x128xf32, #tpu.memory_space<vmem>>, vector<16x128xf32>
      tpu.vector_store %arg21[%c0_74, %c0_75], %117 {strides = array<i32>} : memref<16x128xf32, #tpu.memory_space<vmem>>, vector<16x128xf32>,
    } else {
    }
    %c0 = arith.constant 0 : index
    %c0_1 = arith.constant 0 : index
    %3 = vector.load %arg21[%c0, %c0_1] : memref<16x128xf32, #tpu.memory_space<vmem>>, vector<16x128xf32>
    %c0_2 = arith.constant 0 : index
    %c0_3 = arith.constant 0 : index
    %4 = vector.load %arg4[%c0_2, %c0_3] : memref<1x128xf32, #tpu.memory_space<vmem>>, vector<1x128xf32>
    %c0_4 = arith.constant 0 : index
    %c0_5 = arith.constant 0 : index
    %c0_6 = arith.constant 0 : index
    %5 = vector.load %arg5[%c0_4, %c0_5, %c0_6] : memref<1x1x128xf32, #tpu.memory_space<vmem>>, vector<1x1x128xf32>
    %6 = vector.shape_cast %5 : vector<1x1x128xf32> to vector<1x128xf32>
    %c0_7 = arith.constant 0 : index
    %c0_8 = arith.constant 0 : index
    %c0_9 = arith.constant 0 : index
    %7 = vector.load %arg6[%c0_7, %c0_8, %c0_9] : memref<1x1x128xf32, #tpu.memory_space<vmem>>, vector<1x1x128xf32>
    %8 = vector.shape_cast %7 : vector<1x1x128xf32> to vector<1x128xf32>
    %cst = arith.constant dense<0.000000e+00> : vector<16xf32>
    %9 = vector.multi_reduction <add>, %3, %cst [1] : vector<16x128xf32> to vector<16xf32>
    %10 = vector.shape_cast %9 : vector<16xf32> to vector<16x1xf32>
    %cst_10 = arith.constant 0.020833334 : f32
    %11 = vector.broadcast %cst_10 : f32 to vector<16x1xf32>
    %12 = arith.mulf %10, %11 : vector<16x1xf32>
    %13 = vector.broadcast %12 : vector<16x1xf32> to vector<16x128xf32>
    %14 = arith.subf %3, %13 : vector<16x128xf32>
    %15 = vector.broadcast %4 : vector<1x128xf32> to vector<16x128xf32>
    %16 = arith.mulf %14, %15 : vector<16x128xf32>
    %17 = arith.mulf %16, %16 : vector<16x128xf32>
    %cst_11 = arith.constant dense<0.000000e+00> : vector<16xf32>
    %18 = vector.multi_reduction <add>, %17, %cst_11 [1] : vector<16x128xf32> to vector<16xf32>
    %19 = vector.shape_cast %18 : vector<16xf32> to vector<16x1xf32>
    %cst_12 = arith.constant 0.020833334 : f32
    %20 = vector.broadcast %cst_12 : f32 to vector<16x1xf32>
    %21 = arith.mulf %19, %20 : vector<16x1xf32>
    %cst_13 = arith.constant 9.99999974E-6 : f32
    %22 = vector.broadcast %cst_13 : f32 to vector<16x1xf32>
    %23 = arith.addf %21, %22 : vector<16x1xf32>
    %24 = math.rsqrt %23 : vector<16x1xf32>
    %25 = vector.broadcast %24 : vector<16x1xf32> to vector<16x128xf32>
    %26 = arith.mulf %16, %25 : vector<16x128xf32>
    %27 = vector.broadcast %6 : vector<1x128xf32> to vector<16x128xf32>
    %28 = arith.mulf %26, %27 : vector<16x128xf32>
    %29 = vector.broadcast %8 : vector<1x128xf32> to vector<16x128xf32>
    %30 = arith.addf %28, %29 : vector<16x128xf32>
    %31 = arith.truncf %30 : vector<16x128xf32> to vector<16x128xbf16>
    %c0_14 = arith.constant 0 : index
    %c0_15 = arith.constant 0 : index
    %c0_16 = arith.constant 0 : index
    %32 = vector.load %arg7[%c0_14, %c0_15, %c0_16] : memref<1x128x128xbf16, #tpu.memory_space<vmem>>, vector<1x128x128xbf16>
    %33 = vector.shape_cast %32 : vector<1x128x128xbf16> to vector<128x128xbf16>
    %cst_17 = arith.constant dense<0.000000e+00> : vector<16x128xf32>
    %34 = tpu.matmul %31, %33, %cst_17 {dimension_numbers = #tpu.dot_dimension_numbers<[1], [0], [0], [1], [0, 0, 1, 1], [], []>} : vector<16x128xbf16>, vector<128x128xbf16>, vector<16x128xf32> -> vector<16x128xf32>
    %35 = arith.truncf %34 : vector<16x128xf32> to vector<16x128xbf16>
    %c0_18 = arith.constant 0 : index
    %c0_19 = arith.constant 0 : index
    %c0_20 = arith.constant 0 : index
    %36 = vector.load %arg8[%c0_18, %c0_19, %c0_20] : memref<1x128x128xbf16, #tpu.memory_space<vmem>>, vector<1x128x128xbf16>
    %37 = vector.shape_cast %36 : vector<1x128x128xbf16> to vector<128x128xbf16>
    %cst_21 = arith.constant dense<0.000000e+00> : vector<16x128xf32>
    %38 = tpu.matmul %35, %37, %cst_21 {dimension_numbers = #tpu.dot_dimension_numbers<[1], [0], [0], [1], [0, 0, 1, 1], [], []>} : vector<16x128xbf16>, vector<128x128xbf16>, vector<16x128xf32> -> vector<16x128xf32>
    %39 = vector.shape_cast %38 : vector<16x128xf32> to vector<1x16x128xf32>
    %40 = arith.truncf %39 : vector<1x16x128xf32> to vector<1x16x128xbf16>
    %c0_22 = arith.constant 0 : index
    %c0_23 = arith.constant 0 : index
    %41 = vector.load %arg3[%c0_22, %c0_23] : memref<16x16xbf16, #tpu.memory_space<vmem>>, vector<16x16xbf16>
    %42 = vector.shape_cast %41 : vector<16x16xbf16> to vector<1x16x16xbf16>
    "tpu.trace_start"() <{level = 10 : i32, message = "bqk,bkh->bqh"}> : () -> ()
    %cst_24 = arith.constant dense<0.000000e+00> : vector<1x16x128xf32>
    %43 = tpu.matmul %42, %40, %cst_24 {dimension_numbers = #tpu.dot_dimension_numbers<[2], [1], [1], [2], [0, 0, 0, 1, 1, 2], [0], [0]>} : vector<1x16x16xbf16>, vector<1x16x128xbf16>, vector<1x16x128xf32> -> vector<1x16x128xf32>
    "tpu.trace_stop"() : () -> ()
    %44 = vector.shape_cast %43 : vector<1x16x128xf32> to vector<16x128xf32>
    %45 = arith.truncf %44 : vector<16x128xf32> to vector<16x128xbf16>
    %c0_25 = arith.constant 0 : index
    %c0_26 = arith.constant 0 : index
    %c0_27 = arith.constant 0 : index
    %46 = vector.load %arg9[%c0_25, %c0_26, %c0_27] : memref<1x128x128xbf16, #tpu.memory_space<vmem>>, vector<1x128x128xbf16>
    %47 = vector.shape_cast %46 : vector<1x128x128xbf16> to vector<128x128xbf16>
    %cst_28 = arith.constant dense<0.000000e+00> : vector<16x128xf32>
    %48 = tpu.matmul %45, %47, %cst_28 {dimension_numbers = #tpu.dot_dimension_numbers<[1], [0], [0], [1], [0, 0, 1, 1], [], []>} : vector<16x128xbf16>, vector<128x128xbf16>, vector<16x128xf32> -> vector<16x128xf32>
    %49 = arith.truncf %48 : vector<16x128xf32> to vector<16x128xbf16>
    %c0_29 = arith.constant 0 : index
    %c0_30 = arith.constant 0 : index
    %c0_31 = arith.constant 0 : index
    %50 = vector.load %arg10[%c0_29, %c0_30, %c0_31] : memref<1x128x128xbf16, #tpu.memory_space<vmem>>, vector<1x128x128xbf16>
    %51 = vector.shape_cast %50 : vector<1x128x128xbf16> to vector<128x128xbf16>
    %cst_32 = arith.constant dense<0.000000e+00> : vector<16x128xf32>
    %52 = tpu.matmul %49, %51, %cst_32 {dimension_numbers = #tpu.dot_dimension_numbers<[1], [0], [0], [1], [0, 0, 1, 1], [], []>} : vector<16x128xbf16>, vector<128x128xbf16>, vector<16x128xf32> -> vector<16x128xf32>
    %53 = arith.addf %3, %52 : vector<16x128xf32>
    %c0_33 = arith.constant 0 : index
    %c0_34 = arith.constant 0 : index
    %c0_35 = arith.constant 0 : index
    %54 = vector.load %arg11[%c0_33, %c0_34, %c0_35] : memref<1x1x128xf32, #tpu.memory_space<vmem>>, vector<1x1x128xf32>
    %55 = vector.shape_cast %54 : vector<1x1x128xf32> to vector<1x128xf32>
    %c0_36 = arith.constant 0 : index
    %c0_37 = arith.constant 0 : index
    %c0_38 = arith.constant 0 : index
    %56 = vector.load %arg12[%c0_36, %c0_37, %c0_38] : memref<1x1x128xf32, #tpu.memory_space<vmem>>, vector<1x1x128xf32>
    %57 = vector.shape_cast %56 : vector<1x1x128xf32> to vector<1x128xf32>
    %cst_39 = arith.constant dense<0.000000e+00> : vector<16xf32>
    %58 = vector.multi_reduction <add>, %53, %cst_39 [1] : vector<16x128xf32> to vector<16xf32>
    %59 = vector.shape_cast %58 : vector<16xf32> to vector<16x1xf32>
    %cst_40 = arith.constant 0.020833334 : f32
    %60 = vector.broadcast %cst_40 : f32 to vector<16x1xf32>
    %61 = arith.mulf %59, %60 : vector<16x1xf32>
    %62 = vector.broadcast %61 : vector<16x1xf32> to vector<16x128xf32>
    %63 = arith.subf %53, %62 : vector<16x128xf32>
    %64 = vector.broadcast %4 : vector<1x128xf32> to vector<16x128xf32>
    %65 = arith.mulf %63, %64 : vector<16x128xf32>
    %66 = arith.mulf %65, %65 : vector<16x128xf32>
    %cst_41 = arith.constant dense<0.000000e+00> : vector<16xf32>
    %67 = vector.multi_reduction <add>, %66, %cst_41 [1] : vector<16x128xf32> to vector<16xf32>
    %68 = vector.shape_cast %67 : vector<16xf32> to vector<16x1xf32>
    %cst_42 = arith.constant 0.020833334 : f32
    %69 = vector.broadcast %cst_42 : f32 to vector<16x1xf32>
    %70 = arith.mulf %68, %69 : vector<16x1xf32>
    %cst_43 = arith.constant 9.99999974E-6 : f32
    %71 = vector.broadcast %cst_43 : f32 to vector<16x1xf32>
    %72 = arith.addf %70, %71 : vector<16x1xf32>
    %73 = math.rsqrt %72 : vector<16x1xf32>
    %74 = vector.broadcast %73 : vector<16x1xf32> to vector<16x128xf32>
    %75 = arith.mulf %65, %74 : vector<16x128xf32>
    %76 = vector.broadcast %55 : vector<1x128xf32> to vector<16x128xf32>
    %77 = arith.mulf %75, %76 : vector<16x128xf32>
    %78 = vector.broadcast %57 : vector<1x128xf32> to vector<16x128xf32>
    %79 = arith.addf %77, %78 : vector<16x128xf32>
    %80 = arith.truncf %79 : vector<16x128xf32> to vector<16x128xbf16>
    %c0_44 = arith.constant 0 : index
    %c0_45 = arith.constant 0 : index
    %c0_46 = arith.constant 0 : index
    %81 = vector.load %arg13[%c0_44, %c0_45, %c0_46] : memref<1x128x128xbf16, #tpu.memory_space<vmem>>, vector<1x128x128xbf16>
    %82 = vector.shape_cast %81 : vector<1x128x128xbf16> to vector<128x128xbf16>
    %cst_47 = arith.constant dense<0.000000e+00> : vector<16x128xf32>
    %83 = tpu.matmul %80, %82, %cst_47 {dimension_numbers = #tpu.dot_dimension_numbers<[1], [0], [0], [1], [0, 0, 1, 1], [], []>} : vector<16x128xbf16>, vector<128x128xbf16>, vector<16x128xf32> -> vector<16x128xf32>
    %84 = arith.truncf %83 : vector<16x128xf32> to vector<16x128xbf16>
    %c0_48 = arith.constant 0 : index
    %c0_49 = arith.constant 0 : index
    %c0_50 = arith.constant 0 : index
    %85 = vector.load %arg14[%c0_48, %c0_49, %c0_50] : memref<1x128x128xbf16, #tpu.memory_space<vmem>>, vector<1x128x128xbf16>
    %86 = vector.shape_cast %85 : vector<1x128x128xbf16> to vector<128x128xbf16>
    %cst_51 = arith.constant dense<0.000000e+00> : vector<16x128xf32>
    %87 = tpu.matmul %84, %86, %cst_51 {dimension_numbers = #tpu.dot_dimension_numbers<[1], [0], [0], [1], [0, 0, 1, 1], [], []>} : vector<16x128xbf16>, vector<128x128xbf16>, vector<16x128xf32> -> vector<16x128xf32>
    %88 = arith.negf %87 : vector<16x128xf32>
    %89 = math.exp %88 : vector<16x128xf32>
    %cst_52 = arith.constant 1.000000e+00 : f32
    %90 = vector.broadcast %cst_52 : f32 to vector<16x128xf32>
    %91 = arith.addf %90, %89 : vector<16x128xf32>
    %92 = arith.divf %90, %91 : vector<16x128xf32>
    %93 = arith.mulf %87, %92 : vector<16x128xf32>
    %94 = arith.truncf %93 : vector<16x128xf32> to vector<16x128xbf16>
    %c0_53 = arith.constant 0 : index
    %c0_54 = arith.constant 0 : index
    %c0_55 = arith.constant 0 : index
    %95 = vector.load %arg15[%c0_53, %c0_54, %c0_55] : memref<1x128x128xbf16, #tpu.memory_space<vmem>>, vector<1x128x128xbf16>
    %96 = vector.shape_cast %95 : vector<1x128x128xbf16> to vector<128x128xbf16>
    %cst_56 = arith.constant dense<0.000000e+00> : vector<16x128xf32>
    %97 = tpu.matmul %94, %96, %cst_56 {dimension_numbers = #tpu.dot_dimension_numbers<[1], [0], [0], [1], [0, 0, 1, 1], [], []>} : vector<16x128xbf16>, vector<128x128xbf16>, vector<16x128xf32> -> vector<16x128xf32>
    %98 = arith.truncf %97 : vector<16x128xf32> to vector<16x128xbf16>
    %c0_57 = arith.constant 0 : index
    %c0_58 = arith.constant 0 : index
    %c0_59 = arith.constant 0 : index
    %99 = vector.load %arg16[%c0_57, %c0_58, %c0_59] : memref<1x128x128xbf16, #tpu.memory_space<vmem>>, vector<1x128x128xbf16>
    %100 = vector.shape_cast %99 : vector<1x128x128xbf16> to vector<128x128xbf16>
    %cst_60 = arith.constant dense<0.000000e+00> : vector<16x128xf32>
    %101 = tpu.matmul %98, %100, %cst_60 {dimension_numbers = #tpu.dot_dimension_numbers<[1], [0], [0], [1], [0, 0, 1, 1], [], []>} : vector<16x128xbf16>, vector<128x128xbf16>, vector<16x128xf32> -> vector<16x128xf32>
    %102 = arith.truncf %101 : vector<16x128xf32> to vector<16x128xbf16>
    %c0_61 = arith.constant 0 : index
    %c0_62 = arith.constant 0 : index
    %c0_63 = arith.constant 0 : index
    %103 = vector.load %arg17[%c0_61, %c0_62, %c0_63] : memref<1x128x128xbf16, #tpu.memory_space<vmem>>, vector<1x128x128xbf16>
    %104 = vector.shape_cast %103 : vector<1x128x128xbf16> to vector<128x128xbf16>
    %cst_64 = arith.constant dense<0.000000e+00> : vector<16x128xf32>
    %105 = tpu.matmul %102, %104, %cst_64 {dimension_numbers = #tpu.dot_dimension_numbers<[1], [0], [0], [1], [0, 0, 1, 1], [], []>} : vector<16x128xbf16>, vector<128x128xbf16>, vector<16x128xf32> -> vector<16x128xf32>
    %106 = arith.truncf %105 : vector<16x128xf32> to vector<16x128xbf16>
    %c0_65 = arith.constant 0 : index
    %c0_66 = arith.constant 0 : index
    %c0_67 = arith.constant 0 : index
    %107 = vector.load %arg18[%c0_65, %c0_66, %c0_67] : memref<1x128x128xbf16, #tpu.memory_space<vmem>>, vector<1x128x128xbf16>
    %108 = vector.shape_cast %107 : vector<1x128x128xbf16> to vector<128x128xbf16>
    %cst_68 = arith.constant dense<0.000000e+00> : vector<16x128xf32>
    %109 = tpu.matmul %106, %108, %cst_68 {dimension_numbers = #tpu.dot_dimension_numbers<[1], [0], [0], [1], [0, 0, 1, 1], [], []>} : vector<16x128xbf16>, vector<128x128xbf16>, vector<16x128xf32> -> vector<16x128xf32>
    %110 = arith.addf %53, %109 : vector<16x128xf32>
    %c1_i32 = arith.constant 1 : i32
    %111 = arith.cmpi slt, %arg1, %c1_i32 : i32
    %112 = arith.extui %111 : i1 to i32
    %c0_i32_69 = arith.constant 0 : i32
    %113 = arith.cmpi ne, %112, %c0_i32_69 : i32
    scf.if %113 {
      %c0_72 = arith.constant 0 : index
      %c0_73 = arith.constant 0 : index
      %117 = vector.load %arg21[%c0_72, %c0_73] : memref<16x128xf32, #tpu.memory_space<vmem>>, vector<16x128xf32>
      tpu.vector_store %arg21[%c0_72, %c0_73], %110 {strides = array<i32>} : memref<16x128xf32, #tpu.memory_space<vmem>>, vector<16x128xf32>,
    } else {
    }
    %c1_i32_70 = arith.constant 1 : i32
    %114 = arith.cmpi eq, %arg1, %c1_i32_70 : i32
    %115 = arith.extui %114 : i1 to i32
    %c0_i32_71 = arith.constant 0 : i32
    %116 = arith.cmpi ne, %115, %c0_i32_71 : i32
    scf.if %116 {
      %c0_72 = arith.constant 0 : index
      %c0_73 = arith.constant 0 : index
      %117 = vector.load %arg19[%c0_72, %c0_73] : memref<1x128xf32, #tpu.memory_space<vmem>>, vector<1x128xf32>
      %c0_74 = arith.constant 0 : index
      %c0_75 = arith.constant 0 : index
      %118 = vector.load %arg20[%c0_74, %c0_75] : memref<1x128xf32, #tpu.memory_space<vmem>>, vector<1x128xf32>
      %cst_76 = arith.constant dense<0.000000e+00> : vector<16xf32>
      %119 = vector.multi_reduction <add>, %110, %cst_76 [1] : vector<16x128xf32> to vector<16xf32>
      %120 = vector.shape_cast %119 : vector<16xf32> to vector<16x1xf32>
      %cst_77 = arith.constant 0.020833334 : f32
      %121 = vector.broadcast %cst_77 : f32 to vector<16x1xf32>
      %122 = arith.mulf %120, %121 : vector<16x1xf32>
      %123 = vector.broadcast %122 : vector<16x1xf32> to vector<16x128xf32>
      %124 = arith.subf %110, %123 : vector<16x128xf32>
      %125 = vector.broadcast %4 : vector<1x128xf32> to vector<16x128xf32>
      %126 = arith.mulf %124, %125 : vector<16x128xf32>
      %127 = arith.mulf %126, %126 : vector<16x128xf32>
      %cst_78 = arith.constant dense<0.000000e+00> : vector<16xf32>
      %128 = vector.multi_reduction <add>, %127, %cst_78 [1] : vector<16x128xf32> to vector<16xf32>
      %129 = vector.shape_cast %128 : vector<16xf32> to vector<16x1xf32>
      %cst_79 = arith.constant 0.020833334 : f32
      %130 = vector.broadcast %cst_79 : f32 to vector<16x1xf32>
      %131 = arith.mulf %129, %130 : vector<16x1xf32>
      %cst_80 = arith.constant 9.99999974E-6 : f32
      %132 = vector.broadcast %cst_80 : f32 to vector<16x1xf32>
      %133 = arith.addf %131, %132 : vector<16x1xf32>
      %134 = math.rsqrt %133 : vector<16x1xf32>
      %135 = vector.broadcast %134 : vector<16x1xf32> to vector<16x128xf32>
      %136 = arith.mulf %126, %135 : vector<16x128xf32>
      %137 = vector.broadcast %117 : vector<1x128xf32> to vector<16x128xf32>
      %138 = arith.mulf %136, %137 : vector<16x128xf32>
      %139 = vector.broadcast %118 : vector<1x128xf32> to vector<16x128xf32>
      %140 = arith.addf %138, %139 : vector<16x128xf32>
      %c0_81 = arith.constant 0 : index
      %c0_82 = arith.constant 0 : index
      %141 = vector.load %arg21[%c0_81, %c0_82] : memref<16x128xf32, #tpu.memory_space<vmem>>, vector<16x128xf32>
      tpu.vector_store %arg21[%c0_81, %c0_82], %140 {strides = array<i32>} : memref<16x128xf32, #tpu.memory_space<vmem>>, vector<16x128xf32>,
    } else {
    }
    return
  }
  func.func @transform_0(%arg0: i32, %arg1: i32) -> (i32, i32) {
    %c0_i32 = arith.constant 0 : i32
    %c0_i32_0 = arith.constant 0 : i32
    return %arg0, %c0_i32 : i32, i32
  }
  func.func @transform_1(%arg0: i32, %arg1: i32) -> (i32, i32) {
    %c0_i32 = arith.constant 0 : i32
    %c0_i32_0 = arith.constant 0 : i32
    %c0_i32_1 = arith.constant 0 : i32
    return %c0_i32, %c0_i32_0 : i32, i32
  }
  func.func @transform_2(%arg0: i32, %arg1: i32) -> (i32, i32) {
    %c0_i32 = arith.constant 0 : i32
    %c0_i32_0 = arith.constant 0 : i32
    %c0_i32_1 = arith.constant 0 : i32
    return %c0_i32, %c0_i32_0 : i32, i32
  }
  func.func @transform_3(%arg0: i32, %arg1: i32) -> (i32, i32, i32) {
    %c0_i32 = arith.constant 0 : i32
    %c0_i32_0 = arith.constant 0 : i32
    %c0_i32_1 = arith.constant 0 : i32
    return %arg1, %c0_i32, %c0_i32_0 : i32, i32, i32
  }
  func.func @transform_4(%arg0: i32, %arg1: i32) -> (i32, i32, i32) {
    %c0_i32 = arith.constant 0 : i32
    %c0_i32_0 = arith.constant 0 : i32
    %c0_i32_1 = arith.constant 0 : i32
    return %arg1, %c0_i32, %c0_i32_0 : i32, i32, i32
  }
  func.func @transform_5(%arg0: i32, %arg1: i32) -> (i32, i32, i32) {
    %c0_i32 = arith.constant 0 : i32
    %c0_i32_0 = arith.constant 0 : i32
    %c0_i32_1 = arith.constant 0 : i32
    return %arg1, %c0_i32, %c0_i32_0 : i32, i32, i32
  }
  func.func @transform_6(%arg0: i32, %arg1: i32) -> (i32, i32, i32) {
    %c0_i32 = arith.constant 0 : i32
    %c0_i32_0 = arith.constant 0 : i32
    %c0_i32_1 = arith.constant 0 : i32
    return %arg1, %c0_i32, %c0_i32_0 : i32, i32, i32
  }
  func.func @transform_7(%arg0: i32, %arg1: i32) -> (i32, i32, i32) {
    %c0_i32 = arith.constant 0 : i32
    %c0_i32_0 = arith.constant 0 : i32
    %c0_i32_1 = arith.constant 0 : i32
    return %arg1, %c0_i32, %c0_i32_0 : i32, i32, i32
  }
  func.func @transform_8(%arg0: i32, %arg1: i32) -> (i32, i32, i32) {
    %c0_i32 = arith.constant 0 : i32
    %c0_i32_0 = arith.constant 0 : i32
    %c0_i32_1 = arith.constant 0 : i32
    return %arg1, %c0_i32, %c0_i32_0 : i32, i32, i32
  }
  func.func @transform_9(%arg0: i32, %arg1: i32) -> (i32, i32, i32) {
    %c0_i32 = arith.constant 0 : i32
    %c0_i32_0 = arith.constant 0 : i32
    %c0_i32_1 = arith.constant 0 : i32
    return %arg1, %c0_i32, %c0_i32_0 : i32, i32, i32
  }
  func.func @transform_10(%arg0: i32, %arg1: i32) -> (i32, i32, i32) {
    %c0_i32 = arith.constant 0 : i32
    %c0_i32_0 = arith.constant 0 : i32
    %c0_i32_1 = arith.constant 0 : i32
    return %arg1, %c0_i32, %c0_i32_0 : i32, i32, i32
  }
  func.func @transform_11(%arg0: i32, %arg1: i32) -> (i32, i32, i32) {
    %c0_i32 = arith.constant 0 : i32
    %c0_i32_0 = arith.constant 0 : i32
    %c0_i32_1 = arith.constant 0 : i32
    return %arg1, %c0_i32, %c0_i32_0 : i32, i32, i32
  }
  func.func @transform_12(%arg0: i32, %arg1: i32) -> (i32, i32, i32) {
    %c0_i32 = arith.constant 0 : i32
    %c0_i32_0 = arith.constant 0 : i32
    %c0_i32_1 = arith.constant 0 : i32
    return %arg1, %c0_i32, %c0_i32_0 : i32, i32, i32
  }
  func.func @transform_13(%arg0: i32, %arg1: i32) -> (i32, i32, i32) {
    %c0_i32 = arith.constant 0 : i32
    %c0_i32_0 = arith.constant 0 : i32
    %c0_i32_1 = arith.constant 0 : i32
    return %arg1, %c0_i32, %c0_i32_0 : i32, i32, i32
  }
  func.func @transform_14(%arg0: i32, %arg1: i32) -> (i32, i32, i32) {
    %c0_i32 = arith.constant 0 : i32
    %c0_i32_0 = arith.constant 0 : i32
    %c0_i32_1 = arith.constant 0 : i32
    return %arg1, %c0_i32, %c0_i32_0 : i32, i32, i32
  }
  func.func @transform_15(%arg0: i32, %arg1: i32) -> (i32, i32, i32) {
    %c0_i32 = arith.constant 0 : i32
    %c0_i32_0 = arith.constant 0 : i32
    %c0_i32_1 = arith.constant 0 : i32
    return %arg1, %c0_i32, %c0_i32_0 : i32, i32, i32
  }
  func.func @transform_16(%arg0: i32, %arg1: i32) -> (i32, i32, i32) {
    %c0_i32 = arith.constant 0 : i32
    %c0_i32_0 = arith.constant 0 : i32
    %c0_i32_1 = arith.constant 0 : i32
    return %arg1, %c0_i32, %c0_i32_0 : i32, i32, i32
  }
  func.func @transform_17(%arg0: i32, %arg1: i32) -> (i32, i32) {
    %c0_i32 = arith.constant 0 : i32
    %c0_i32_0 = arith.constant 0 : i32
    %c0_i32_1 = arith.constant 0 : i32
    return %c0_i32, %c0_i32_0 : i32, i32
  }
  func.func @transform_18(%arg0: i32, %arg1: i32) -> (i32, i32) {
    %c0_i32 = arith.constant 0 : i32
    %c0_i32_0 = arith.constant 0 : i32
    %c0_i32_1 = arith.constant 0 : i32
    return %c0_i32, %c0_i32_0 : i32, i32
  }
  func.func @transform_19(%arg0: i32, %arg1: i32) -> (i32, i32) {
    %c0_i32 = arith.constant 0 : i32
    %c0_i32_0 = arith.constant 0 : i32
    return %arg0, %c0_i32 : i32, i32
  }
}

</mosaic_0001>

<bundles_post_ra>
// kernel: tpu_custom_call.1
= control target key start
LH: loop header
LB: loop body
LE: loop exit
PB: predicated region body
PF: predicated region fallthrough
CT: control target
= control target key end

     0   :  { %s5009_s0 = inlined_call_operand.hbm [shape: f32[32,128], index: 0, kind: input, shape index: {}]   ;;  %s5010_s1 = inlined_call_operand.hbm [shape: bf16[16,16], index: 1, kind: input, shape index: {}]   ;;  %s5011_s2 = inlined_call_operand.vmem [shape: f32[1,128], index: 2, kind: input, shape index: {}]   ;;  %s5012_s3 = inlined_call_operand.vmem [shape: f32[2,1,128], index: 3, kind: input, shape index: {}]   ;;  %s5013_s4 = inlined_call_operand.vmem [shape: f32[2,1,128], index: 4, kind: input, shape index: {}]   ;;  %s5014_s5 = inlined_call_operand.hbm [shape: bf16[2,128,128], index: 5, kind: input, shape index: {}]   ;;  %s5015_s6 = inlined_call_operand.hbm [shape: bf16[2,128,128], index: 6, kind: input, shape index: {}]   ;;  %s5016_s7 = inlined_call_operand.hbm [shape: bf16[2,128,128], index: 7, kind: input, shape index: {}]   ;;  %s5017_s8 = inlined_call_operand.hbm [shape: bf16[2,128,128], index: 8, kind: input, shape index: {}]   ;;  %s5018_s9 = inlined_call_operand.vmem [shape: f32[2,1,128], index: 9, kind: input, shape index: {}]   ;;  %s5019_s10 = inlined_call_operand.vmem [shape: f32[2,1,128], index: 10, kind: input, shape index: {}]   ;;  %s5020_s11 = inlined_call_operand.hbm [shape: bf16[2,128,128], index: 11, kind: input, shape index: {}]   ;;  %s5021_s12 = inlined_call_operand.hbm [shape: bf16[2,128,128], index: 12, kind: input, shape index: {}]   ;;  %s5022_s13 = inlined_call_operand.hbm [shape: bf16[2,128,128], index: 13, kind: input, shape index: {}]   ;;  %s5023_s14 = inlined_call_operand.hbm [shape: bf16[2,128,128], index: 14, kind: input, shape index: {}]   ;;  %s5024_s15 = inlined_call_operand.hbm [shape: bf16[2,128,128], index: 15, kind: input, shape index: {}]   ;;  %s5025_s16 = inlined_call_operand.hbm [shape: bf16[2,128,128], index: 16, kind: input, shape index: {}]   ;;  %s5026_s17 = inlined_call_operand.vmem [shape: f32[1,128], index: 17, kind: input, shape index: {}]   ;;  %s5027_s18 = inlined_call_operand.vmem [shape: f32[1,128], index: 18, kind: input, shape index: {}]   ;;  %s5028_s19 = inlined_call_operand.hbm [shape: f32[32,128], index: 19, kind: output, shape index: {}]  }
   0x1   :  { %5060 = sst [smem:[#allocation32_spill]] %s5009_s0 }
   0x2   :  { %5061 = sst [smem:[#allocation33_spill]] %s5010_s1 }
   0x3   :  { %5062 = sst [smem:[#allocation34_spill]] %s5011_s2 }
   0x4   :  { %5063 = sst [smem:[#allocation35_spill]] %s5012_s3 }
   0x5   :  { %5064 = sst [smem:[#allocation36_spill]] %s5013_s4 }
   0x6   :  { %5065 = sst [smem:[#allocation37_spill]] %s5014_s5 }
   0x7   :  { %5066 = sst [smem:[#allocation38_spill]] %s5015_s6 }
   0x8   :  { %5067 = sst [smem:[#allocation39_spill]] %s5016_s7 }
   0x9   :  { %5068 = sst [smem:[#allocation40_spill]] %s5017_s8 }
   0xa   :  { %5069 = sst [smem:[#allocation41_spill]] %s5018_s9 }
   0xb   :  { %5070 = sst [smem:[#allocation42_spill]] %s5019_s10 }
   0xc   :  { %5071 = sst [smem:[#allocation43_spill]] %s5020_s11 }
   0xd   :  { %5072 = sst [smem:[#allocation44_spill]] %s5021_s12 }
   0xe   :  { %5073 = sst [smem:[#allocation45_spill]] %s5022_s13 }
   0xf   :  { %5074 = sst [smem:[#allocation46_spill]] %s5023_s14 }
  0x10   :  { %5075 = sst [smem:[#allocation47_spill]] %s5024_s15 }
  0x11   :  { %5076 = sst [smem:[#allocation48_spill]] %s5025_s16 }
  0x12   :  { %5077 = sst [smem:[#allocation49_spill]] %s5026_s17 }
  0x13   :  { %5078 = sst [smem:[#allocation50_spill]] %s5027_s18 }
  0x14   :  { %5079 = sst [smem:[#allocation51_spill]] %s5028_s19 }
  0x15   :  { %24 = vsyncpa [#allocation3], 0 }
  0x16   :  { %26 = vsyncpa [#allocation3 + $0x1], 0 }
  0x17   :  { %27 = vsyncpa [#allocation6], 0 }
  0x18   :  { %28 = vsyncpa [#allocation4], 0 }
  0x19   :  { %30 = vsyncpa [#allocation4 + $0x1], 0  ;;  %s4051_s0 = smov 0   ;;  %s4053_s30 = smov 0  }
  0x1a   :  { %s4055_s20 = smov 0   ;;  %s4057_s21 = smov 0  }
  0x1b   :  { %s4059_s1 = smov 0   ;;  %s4061_s22 = smov 0  }
  0x1c   :  { %s4063_s2 = smov 0   ;;  %s4065_s23 = smov 0  }
  0x1d   :  { %s4067_s24 = smov 0   ;;  %s4069_s25 = smov 0  }
  0x1e   :  { %s4071_s3 = smov 0  }
  0x1f LB: > { %5080 = sst [smem:[#allocation22_spill]] %s3888_s0  ;;  %s45_s26 = sadd.s32 1, %s3920_s24  ;;  %s3928_s3 = sphi %s4071_s3, %s36_s3   ;;  %s3924_s25 = sphi %s4069_s25, %s5156_s25   ;;  %s3920_s24 = sphi %s4067_s24, %s5155_s24   ;;  %s3916_s23 = sphi %s4065_s23, %s5161_s23   ;;  %s3912_s2 = sphi %s4063_s2, %s5153_s2   ;;  %s3908_s22 = sphi %s4061_s22, %s5160_s22   ;;  %s3904_s1 = sphi %s4059_s1, %s5159_s1   ;;  %s3900_s21 = sphi %s4057_s21, %s5151_s21   ;;  %s3896_s20 = sphi %s4055_s20, %s5158_s20   ;;  %s3892_s30 = sphi %s4053_s30, %s5157_s30   ;;  %s3888_s0 = sphi %s4051_s0, %s5150_s0  }
  0x20   : > { %5081 = sst [smem:[#allocation23_spill]] %s3892_s30  ;;  %s48_s27 = sadd.s32 1, %s3924_s25 }
  0x21   : > { %5082 = sst [smem:[#allocation24_spill]] %s3904_s1  ;;  %p46_p0 = scmp.ge.s32.totalorder %s45_s26, 2 }
  0x22   : > { %5083 = sst [smem:[#allocation25_spill]] %s3912_s2  ;;  %s55_s28 = sadd.s32 1, %s3908_s22 }
  0x23   : > { %5084 = sst [smem:[#allocation26_spill]] %s3916_s23  ;;  %p5041_p1 = scmp.ne.s32.totalorder %s3908_s22, %s3904_s1 }
  0x24   : > { %5085 = sst [smem:[#allocation27_spill]] %s3920_s24  ;;  %p63_p2 = scmp.eq.s32.totalorder %s3928_s3, 0 }
  0x25   : > { %5086 = sst [smem:[#allocation28_spill]] %s3924_s25  ;;  %s5163_s26 = smov (%p46_p0, %s45_s26), 0 }
  0x26   : > { %5087 = sst [smem:[#allocation29_spill]] %s5163_s26  ;;  %s5165_s27 = smov (!%p46_p0, %s48_s27), %s3924_s25 }
  0x27   : > { %p4118_p3 = por %p63_p2, %p5041_p1  ;;  %s172_s19 = ssub.s32 %s3920_s24, %s5163_s26 }
  0x28   : > { %p50_p4 = scmp.ge.s32.totalorder %s5165_s27, 2  ;;  %p173_p5 = scmp.eq.s32.totalorder %s172_s19, 0 }
  0x29   : > { %s175_s23 = sadd.s32 1, %s3896_s20  ;;  %p182_p6 = scmp.ne.s32.totalorder %s3896_s20, %s3892_s30 }
  0x2a   : > { %s5167_s27 = smov (%p50_p4, %s5165_s27), 0  ;;  %p5042_p9 = scmp.lt.s32.totalorder %s3928_s3, 4 }
  0x2b   : > { %5089 = sst [smem:[#allocation30_spill]] %s5167_s27  ;;  %s52_s17 = ssub.s32 %s3924_s25, %s5167_s27 }
  0x2c   : > { %s4130_s18 = scalar_select %p173_p5, %s3896_s20, %s175_s23  }
  0x2d   : > { %p4134_p7 = por %p182_p6, %p63_p2  ;;  %p53_p8 = scmp.eq.s32.totalorder %s52_s17, 0 }
  0x2e   : > { %s588_s9 = sand.u32 1, %s3928_s3   ;;  %s590_s19 = sand.u32 1, %s3908_s22  }
  0x2f   : > { %s4141_s26 = scalar_select %p53_p8, %s3908_s22, %s55_s28  }
  0x30   : > { %s2712_s4 = sshll.u32 %s590_s19, 4  ;;  %s2858_s2 = sshll.u32 %s3924_s25, 8 }
  0x31   : > { %5091 = sst [smem:[#allocation31_spill]] %s4141_s26  ;;  %s5092_s0 = sld [smem:[#allocation32_spill]] }
  0x32   : > { %s592_s23 = scalar_lea.vmem [#allocation2], %s2712_s4  ;;  %p4154_p10 = pnand %p5042_p9, %p4118_p3 }
  0x33   : > { %s599_s27 = sshll.u32 %s592_s23, 4  ;;  %s4160_s28 = scalar_lea.sflag [#allocation3], %s588_s9  ;;  %s4158_s27 = int_to_ptr.vmem [resolvable:$true] %s599_s27 }
  0x34   : > { %p3442_p12 = pneg %p4154_p10 }
  0x37   : > { %s5093_s15 = smov %s5092_s0  ;;  %s4148_s1 = scalar_lea.hbm %s5092_s0, %s2858_s2 }
  0x38   : > { %s3440_s16 = scalar_lea.hbm %s4148_s1, 256  ;;  %s3445_s30 = scalar_lea.hbm %s5093_s15, 512 }
  0x39   : > { %p3441_p11 = scmp.ne.s32.totalorder %s4148_s1, %s3440_s16  ;;  %p3446_p2 = scmp.lt.u32.totalorder %s4148_s1, %s5093_s15 }
  0x3a   : > { %p3447_p3 = scmp.lt.u32.totalorder %s3445_s30, %s3440_s16  ;;  %p3449_p5 = scmp.lt.u32.totalorder %s3440_s16, %s4148_s1 }
  0x3b   : > { %p3443_p13 = pnand %p3442_p12, %p3441_p11 }
  0x3c   : > { %p3448_p4 = por %p3447_p3, %p3446_p2 }
  0x3d   : > { %p3444_p0 = pneg %p3443_p13 }
  0x3e   : > { %p3450_p6 = por %p3449_p5, %p3448_p4 }
  0x40   : > { %p3451_p8 = pnand %p3450_p6, %p3444_p0 }
  0x42   : > { %3454 = shalt.err (!%p3451_p8)
}
  0x43   : > { %s3455_s9 = scalar_lea.vmem %s4158_s27, 256  ;;  %s3930_s19 = smov [#allocation2]  }
  0x44   : > { %p3456_p11 = scmp.ne.s32.totalorder %s4158_s27, %s3455_s9  ;;  %s3460_s23 = sshll.u32 %s3930_s19, 4  ;;  %s3461_s23 = int_to_ptr.vmem [resolvable:$false] %s3460_s23 }
  0x45   : > { %s3462_s4 = scalar_lea.vmem %s3461_s23, 512  ;;  %p3463_p9 = scmp.lt.s32.totalorder %s4158_s27, %s3461_s23 }
  0x46   : > { %p3458_p13 = pnand %p3456_p11, %p3442_p12  ;;  %p3464_p2 = scmp.lt.s32.totalorder %s3462_s4, %s3455_s9 }
  0x48   : > { %p3459_p1 = pneg %p3458_p13  ;;  %p3465_p3 = por %p3464_p2, %p3463_p9 }
  0x4a   : > { %p3466_p4 = pnand %p3465_p3, %p3459_p1 }
  0x4c   : > { %3469 = shalt.err (!%p3466_p4)
}
  0x4d   : > { %s3931_s16 = smov 128   ;;  %s3932_s0 = smov 8  }
  0x4e   : > { %3203 = dma.hbm_to_vmem [thread:$0]  (!%p4154_p10), %s4148_s1, 256, %s4158_s27, %s4160_s28, %s3931_s16, %s3931_s16, %s3932_s0  }
  0x4f   : > { %s623_s30 = sand.u32 1, %s3896_s20   ;;  %s4190_s2 = sshll.u32 %s3920_s24, 10 }
  0x50   : > { %s4192_s29 = sshll.u32 %s623_s30, 6  ;;  %p5095_p1 = scmp.lt.s32.totalorder %s3928_s3, 4 }
  0x51   : > { %s5097_s5 = sld [smem:[#allocation37_spill]]  ;;  %s625_s1 = scalar_lea.vmem [#allocation7], %s4192_s29 }
  0x52   : > { %p4198_p9 = pnand %p5095_p1, %p4134_p7  ;;  %s632_s27 = sshll.u32 %s625_s1, 4  ;;  %s4209_s27 = int_to_ptr.vmem [resolvable:$true] %s632_s27 }
  0x54   : > { %s5096_s9 = scalar_select %p4198_p9, 1, 0 }
  0x55   : > { %p4215_p7 = pneg %p4198_p9 }
  0x57   : > { %s4206_s4 = scalar_lea.hbm %s5097_s5, %s4190_s2  ;;  %s3475_s30 = scalar_lea.hbm %s5097_s5, 2048 }
  0x58   : > { %s3470_s10 = scalar_lea.hbm %s4206_s4, 1024  ;;  %p3476_p5 = scmp.lt.u32.totalorder %s4206_s4, %s5097_s5 }
  0x59   : > { %p3471_p10 = scmp.ne.s32.totalorder %s4206_s4, %s3470_s10  ;;  %p3477_p6 = scmp.lt.u32.totalorder %s3475_s30, %s3470_s10 }
  0x5a   : > { %p3479_p11 = scmp.lt.u32.totalorder %s3470_s10, %s4206_s4 }
  0x5b   : > { %p3473_p12 = pnand %p4215_p7, %p3471_p10  ;;  %p3478_p8 = por %p3477_p6, %p3476_p5 }
  0x5d   : > { %p3474_p0 = pneg %p3473_p12  ;;  %p3480_p13 = por %p3479_p11, %p3478_p8 }
  0x5f   : > { %p3481_p2 = pnand %p3480_p13, %p3474_p0 }
  0x61   : > { %3484 = shalt.err (!%p3481_p2)
}
  0x62   : > { %s3485_s1 = scalar_lea.vmem %s4209_s27, 1024  ;;  %s3933_s16 = smov [#allocation7]  }
  0x63   : > { %p3486_p3 = scmp.ne.s32.totalorder %s4209_s27, %s3485_s1  ;;  %s3490_s0 = sshll.u32 %s3933_s16, 4  ;;  %s3491_s0 = int_to_ptr.vmem [resolvable:$false] %s3490_s0 }
  0x64   : > { %s3492_s19 = scalar_lea.vmem %s3491_s0, 2048  ;;  %p3493_p10 = scmp.lt.s32.totalorder %s4209_s27, %s3491_s0 }
  0x65   : > { %p3488_p4 = pnand %p3486_p3, %p4215_p7  ;;  %p3494_p12 = scmp.lt.s32.totalorder %s3492_s19, %s3485_s1 }
  0x67   : > { %p3489_p1 = pneg %p3488_p4  ;;  %p3495_p5 = por %p3494_p12, %p3493_p10 }
  0x69   : > { %p3496_p6 = pnand %p3495_p5, %p3489_p1 }
  0x6b   : > { %3499 = shalt.err (!%p3496_p6)
}
  0x6c   : > { %s5045_s10 = smov 64   ;;  %s5047_s30 = smov 4  }
  0x6d   : > { %3206 = dma.hbm_to_vmem [thread:$0]  (!%p4198_p9), %s4206_s4, 1024, %s4209_s27, %s4160_s28, %s5045_s10, %s5045_s10, %s5047_s30  }
  0x6e   : > { %s5099_s6 = sld [smem:[#allocation38_spill]]  ;;  %s646_s0 = scalar_lea.vmem [#allocation8], %s4192_s29 }
  0x6f   : > { %s653_s19 = sshll.u32 %s646_s0, 4  ;;  %s4249_s19 = int_to_ptr.vmem [resolvable:$true] %s653_s19 }
  0x74   : > { %s4246_s1 = scalar_lea.hbm %s5099_s6, %s4190_s2  ;;  %s3505_s27 = scalar_lea.hbm %s5099_s6, 2048 }
  0x75   : > { %s3500_s5 = scalar_lea.hbm %s4246_s1, 1024  ;;  %p3506_p13 = scmp.lt.u32.totalorder %s4246_s1, %s5099_s6 }
  0x76   : > { %p3501_p0 = scmp.ne.s32.totalorder %s4246_s1, %s3500_s5  ;;  %p3507_p2 = scmp.lt.u32.totalorder %s3505_s27, %s3500_s5 }
  0x77   : > { %p3509_p4 = scmp.lt.u32.totalorder %s3500_s5, %s4246_s1 }
  0x78   : > { %p3503_p8 = pnand %p3501_p0, %p4215_p7  ;;  %p3508_p3 = por %p3507_p2, %p3506_p13 }
  0x7a   : > { %p3504_p11 = pneg %p3503_p8  ;;  %p3510_p1 = por %p3509_p4, %p3508_p3 }
  0x7c   : > { %p3511_p10 = pnand %p3510_p1, %p3504_p11 }
  0x7e   : > { %3514 = shalt.err (!%p3511_p10)
}
  0x7f   : > { %s3515_s0 = scalar_lea.vmem %s4249_s19, 1024  ;;  %s3936_s15 = smov [#allocation8]  }
  0x80   : > { %p3516_p12 = scmp.ne.s32.totalorder %s4249_s19, %s3515_s0  ;;  %s3520_s4 = sshll.u32 %s3936_s15, 4  ;;  %s3521_s4 = int_to_ptr.vmem [resolvable:$false] %s3520_s4 }
  0x81   : > { %s3522_s23 = scalar_lea.vmem %s3521_s4, 2048  ;;  %p3523_p0 = scmp.lt.s32.totalorder %s4249_s19, %s3521_s4 }
  0x82   : > { %p3518_p5 = pnand %p3516_p12, %p4215_p7  ;;  %p3524_p8 = scmp.lt.s32.totalorder %s3522_s23, %s3515_s0 }
  0x84   : > { %p3519_p6 = pneg %p3518_p5  ;;  %p3525_p13 = por %p3524_p8, %p3523_p0 }
  0x86   : > { %p3526_p2 = pnand %p3525_p13, %p3519_p6 }
  0x88   : > { %3529 = shalt.err (!%p3526_p2)
}
  0x89   : > { %3209 = dma.hbm_to_vmem [thread:$0]  (!%p4198_p9), %s4246_s1, 1024, %s4249_s19, %s4160_s28, %s5045_s10, %s5045_s10, %s5047_s30  }
  0x8a   : > { %s5100_s7 = sld [smem:[#allocation39_spill]]  ;;  %s667_s0 = scalar_lea.vmem [#allocation9], %s4192_s29 }
  0x8b   : > { %s674_s15 = sshll.u32 %s667_s0, 4  ;;  %s4283_s15 = int_to_ptr.vmem [resolvable:$true] %s674_s15 }
  0x90   : > { %s4280_s16 = scalar_lea.hbm %s5100_s7, %s4190_s2  ;;  %s3535_s19 = scalar_lea.hbm %s5100_s7, 2048 }
  0x91   : > { %s3530_s4 = scalar_lea.hbm %s4280_s16, 1024  ;;  %p3536_p1 = scmp.lt.u32.totalorder %s4280_s16, %s5100_s7 }
  0x92   : > { %p3531_p11 = scmp.ne.s32.totalorder %s4280_s16, %s3530_s4  ;;  %p3537_p10 = scmp.lt.u32.totalorder %s3535_s19, %s3530_s4 }
  0x93   : > { %p3539_p5 = scmp.lt.u32.totalorder %s3530_s4, %s4280_s16 }
  0x94   : > { %p3533_p3 = pnand %p3531_p11, %p4215_p7  ;;  %p3538_p12 = por %p3537_p10, %p3536_p1 }
  0x96   : > { %p3534_p4 = pneg %p3533_p3  ;;  %p3540_p6 = por %p3539_p5, %p3538_p12 }
  0x98   : > { %p3541_p0 = pnand %p3540_p6, %p3534_p4 }
  0x9a   : > { %3544 = shalt.err (!%p3541_p0)
}
  0x9b   : > { %s3545_s0 = scalar_lea.vmem %s4283_s15, 1024  ;;  %s3937_s23 = smov [#allocation9]  }
  0x9c   : > { %p3546_p8 = scmp.ne.s32.totalorder %s4283_s15, %s3545_s0  ;;  %s3550_s1 = sshll.u32 %s3937_s23, 4  ;;  %s3551_s1 = int_to_ptr.vmem [resolvable:$false] %s3550_s1 }
  0x9d   : > { %s3552_s5 = scalar_lea.vmem %s3551_s1, 2048  ;;  %p3553_p11 = scmp.lt.s32.totalorder %s4283_s15, %s3551_s1 }
  0x9e   : > { %p3548_p13 = pnand %p3546_p8, %p4215_p7  ;;  %p3554_p3 = scmp.lt.s32.totalorder %s3552_s5, %s3545_s0 }
  0xa0   : > { %p3549_p2 = pneg %p3548_p13  ;;  %p3555_p1 = por %p3554_p3, %p3553_p11 }
  0xa2   : > { %p3556_p10 = pnand %p3555_p1, %p3549_p2 }
  0xa4   : > { %3559 = shalt.err (!%p3556_p10)
}
  0xa5   : > { %3212 = dma.hbm_to_vmem [thread:$0]  (!%p4198_p9), %s4280_s16, 1024, %s4283_s15, %s4160_s28, %s5045_s10, %s5045_s10, %s5047_s30  }
  0xa6   : > { %s5101_s8 = sld [smem:[#allocation40_spill]]  ;;  %s688_s0 = scalar_lea.vmem [#allocation10], %s4192_s29 }
  0xa7   : > { %s695_s23 = sshll.u32 %s688_s0, 4  ;;  %s4317_s23 = int_to_ptr.vmem [resolvable:$true] %s695_s23 }
  0xac   : > { %s4314_s27 = scalar_lea.hbm %s5101_s8, %s4190_s2  ;;  %s3565_s15 = scalar_lea.hbm %s5101_s8, 2048 }
  0xad   : > { %s3560_s1 = scalar_lea.hbm %s4314_s27, 1024  ;;  %p3566_p6 = scmp.lt.u32.totalorder %s4314_s27, %s5101_s8 }
  0xae   : > { %p3561_p4 = scmp.ne.s32.totalorder %s4314_s27, %s3560_s1  ;;  %p3567_p0 = scmp.lt.u32.totalorder %s3565_s15, %s3560_s1 }
  0xaf   : > { %p3569_p13 = scmp.lt.u32.totalorder %s3560_s1, %s4314_s27 }
  0xb0   : > { %p3563_p12 = pnand %p3561_p4, %p4215_p7  ;;  %p3568_p8 = por %p3567_p0, %p3566_p6 }
  0xb2   : > { %p3564_p5 = pneg %p3563_p12  ;;  %p3570_p2 = por %p3569_p13, %p3568_p8 }
  0xb4   : > { %p3571_p11 = pnand %p3570_p2, %p3564_p5 }
  0xb6   : > { %3574 = shalt.err (!%p3571_p11)
}
  0xb7   : > { %s3575_s0 = scalar_lea.vmem %s4317_s23, 1024  ;;  %s3938_s5 = smov [#allocation10]  }
  0xb8   : > { %p3576_p3 = scmp.ne.s32.totalorder %s4317_s23, %s3575_s0  ;;  %s3580_s16 = sshll.u32 %s3938_s5, 4  ;;  %s3581_s16 = int_to_ptr.vmem [resolvable:$false] %s3580_s16 }
  0xb9   : > { %s3582_s4 = scalar_lea.vmem %s3581_s16, 2048  ;;  %p3583_p4 = scmp.lt.s32.totalorder %s4317_s23, %s3581_s16 }
  0xba   : > { %p3578_p1 = pnand %p3576_p3, %p4215_p7  ;;  %p3584_p12 = scmp.lt.s32.totalorder %s3582_s4, %s3575_s0 }
  0xbc   : > { %p3579_p10 = pneg %p3578_p1  ;;  %p3585_p6 = por %p3584_p12, %p3583_p4 }
  0xbe   : > { %p3586_p0 = pnand %p3585_p6, %p3579_p10 }
  0xc0   : > { %3589 = shalt.err (!%p3586_p0)
}
  0xc1   : > { %3215 = dma.hbm_to_vmem [thread:$0]  (!%p4198_p9), %s4314_s27, 1024, %s4317_s23, %s4160_s28, %s5045_s10, %s5045_s10, %s5047_s30  }
  0xc2   : > { %s5102_s11 = sld [smem:[#allocation43_spill]]  ;;  %s721_s0 = scalar_lea.vmem [#allocation11], %s4192_s29 }
  0xc3   : > { %s728_s5 = sshll.u32 %s721_s0, 4  ;;  %s4351_s5 = int_to_ptr.vmem [resolvable:$true] %s728_s5 }
  0xc8   : > { %s4348_s19 = scalar_lea.hbm %s5102_s11, %s4190_s2  ;;  %s3595_s23 = scalar_lea.hbm %s5102_s11, 2048 }
  0xc9   : > { %s3590_s16 = scalar_lea.hbm %s4348_s19, 1024  ;;  %p3596_p2 = scmp.lt.u32.totalorder %s4348_s19, %s5102_s11 }
  0xca   : > { %p3591_p5 = scmp.ne.s32.totalorder %s4348_s19, %s3590_s16  ;;  %p3597_p11 = scmp.lt.u32.totalorder %s3595_s23, %s3590_s16 }
  0xcb   : > { %p3599_p1 = scmp.lt.u32.totalorder %s3590_s16, %s4348_s19 }
  0xcc   : > { %p3593_p8 = pnand %p3591_p5, %p4215_p7  ;;  %p3598_p3 = por %p3597_p11, %p3596_p2 }
  0xce   : > { %p3594_p13 = pneg %p3593_p8  ;;  %p3600_p10 = por %p3599_p1, %p3598_p3 }
  0xd0   : > { %p3601_p4 = pnand %p3600_p10, %p3594_p13 }
  0xd2   : > { %3604 = shalt.err (!%p3601_p4)
}
  0xd3   : > { %s3605_s0 = scalar_lea.vmem %s4351_s5, 1024  ;;  %s3939_s4 = smov [#allocation11]  }
  0xd4   : > { %p3606_p12 = scmp.ne.s32.totalorder %s4351_s5, %s3605_s0  ;;  %s3610_s27 = sshll.u32 %s3939_s4, 4  ;;  %s3611_s27 = int_to_ptr.vmem [resolvable:$false] %s3610_s27 }
  0xd5   : > { %s3612_s1 = scalar_lea.vmem %s3611_s27, 2048  ;;  %p3613_p5 = scmp.lt.s32.totalorder %s4351_s5, %s3611_s27 }
  0xd6   : > { %p3608_p6 = pnand %p3606_p12, %p4215_p7  ;;  %p3614_p8 = scmp.lt.s32.totalorder %s3612_s1, %s3605_s0 }
  0xd8   : > { %p3609_p0 = pneg %p3608_p6  ;;  %p3615_p2 = por %p3614_p8, %p3613_p5 }
  0xda   : > { %p3616_p11 = pnand %p3615_p2, %p3609_p0 }
  0xdc   : > { %3619 = shalt.err (!%p3616_p11)
}
  0xdd   : > { %3218 = dma.hbm_to_vmem [thread:$0]  (!%p4198_p9), %s4348_s19, 1024, %s4351_s5, %s4160_s28, %s5045_s10, %s5045_s10, %s5047_s30  }
  0xde   : > { %s5103_s12 = sld [smem:[#allocation44_spill]]  ;;  %s742_s0 = scalar_lea.vmem [#allocation12], %s4192_s29 }
  0xdf   : > { %s749_s4 = sshll.u32 %s742_s0, 4  ;;  %s4385_s4 = int_to_ptr.vmem [resolvable:$true] %s749_s4 }
  0xe4   : > { %s4382_s15 = scalar_lea.hbm %s5103_s12, %s4190_s2  ;;  %s3625_s5 = scalar_lea.hbm %s5103_s12, 2048 }
  0xe5   : > { %s3620_s27 = scalar_lea.hbm %s4382_s15, 1024  ;;  %p3626_p10 = scmp.lt.u32.totalorder %s4382_s15, %s5103_s12 }
  0xe6   : > { %p3621_p13 = scmp.ne.s32.totalorder %s4382_s15, %s3620_s27  ;;  %p3627_p4 = scmp.lt.u32.totalorder %s3625_s5, %s3620_s27 }
  0xe7   : > { %p3629_p6 = scmp.lt.u32.totalorder %s3620_s27, %s4382_s15 }
  0xe8   : > { %p3623_p3 = pnand %p3621_p13, %p4215_p7  ;;  %p3628_p12 = por %p3627_p4, %p3626_p10 }
  0xea   : > { %p3624_p1 = pneg %p3623_p3  ;;  %p3630_p0 = por %p3629_p6, %p3628_p12 }
  0xec   : > { %p3631_p5 = pnand %p3630_p0, %p3624_p1 }
  0xee   : > { %3634 = shalt.err (!%p3631_p5)
}
  0xef   : > { %s3635_s0 = scalar_lea.vmem %s4385_s4, 1024  ;;  %s3940_s1 = smov [#allocation12]  }
  0xf0   : > { %p3636_p8 = scmp.ne.s32.totalorder %s4385_s4, %s3635_s0  ;;  %s3640_s19 = sshll.u32 %s3940_s1, 4  ;;  %s3641_s19 = int_to_ptr.vmem [resolvable:$false] %s3640_s19 }
  0xf1   : > { %s3642_s16 = scalar_lea.vmem %s3641_s19, 2048  ;;  %p3643_p13 = scmp.lt.s32.totalorder %s4385_s4, %s3641_s19 }
  0xf2   : > { %p3638_p2 = pnand %p3636_p8, %p4215_p7  ;;  %p3644_p3 = scmp.lt.s32.totalorder %s3642_s16, %s3635_s0 }
  0xf4   : > { %p3639_p11 = pneg %p3638_p2  ;;  %p3645_p10 = por %p3644_p3, %p3643_p13 }
  0xf6   : > { %p3646_p4 = pnand %p3645_p10, %p3639_p11 }
  0xf8   : > { %3649 = shalt.err (!%p3646_p4)
}
  0xf9   : > { %3221 = dma.hbm_to_vmem [thread:$0]  (!%p4198_p9), %s4382_s15, 1024, %s4385_s4, %s4160_s28, %s5045_s10, %s5045_s10, %s5047_s30  }
  0xfa   : > { %s5104_s13 = sld [smem:[#allocation45_spill]]  ;;  %s763_s0 = scalar_lea.vmem [#allocation13], %s4192_s29 }
  0xfb   : > { %s770_s1 = sshll.u32 %s763_s0, 4  ;;  %s4419_s1 = int_to_ptr.vmem [resolvable:$true] %s770_s1 }
 0x100   : > { %s4416_s23 = scalar_lea.hbm %s5104_s13, %s4190_s2  ;;  %s3655_s4 = scalar_lea.hbm %s5104_s13, 2048 }
 0x101   : > { %s3650_s19 = scalar_lea.hbm %s4416_s23, 1024  ;;  %p3656_p0 = scmp.lt.u32.totalorder %s4416_s23, %s5104_s13 }
 0x102   : > { %p3651_p1 = scmp.ne.s32.totalorder %s4416_s23, %s3650_s19  ;;  %p3657_p5 = scmp.lt.u32.totalorder %s3655_s4, %s3650_s19 }
 0x103   : > { %p3659_p2 = scmp.lt.u32.totalorder %s3650_s19, %s4416_s23 }
 0x104   : > { %p3653_p12 = pnand %p3651_p1, %p4215_p7  ;;  %p3658_p8 = por %p3657_p5, %p3656_p0 }
 0x106   : > { %p3654_p6 = pneg %p3653_p12  ;;  %p3660_p11 = por %p3659_p2, %p3658_p8 }
 0x108   : > { %p3661_p13 = pnand %p3660_p11, %p3654_p6 }
 0x10a   : > { %3664 = shalt.err (!%p3661_p13)
}
 0x10b   : > { %s3665_s0 = scalar_lea.vmem %s4419_s1, 1024  ;;  %s3941_s16 = smov [#allocation13]  }
 0x10c   : > { %p3666_p3 = scmp.ne.s32.totalorder %s4419_s1, %s3665_s0  ;;  %s3670_s15 = sshll.u32 %s3941_s16, 4  ;;  %s3671_s15 = int_to_ptr.vmem [resolvable:$false] %s3670_s15 }
 0x10d   : > { %s3672_s27 = scalar_lea.vmem %s3671_s15, 2048  ;;  %p3673_p1 = scmp.lt.s32.totalorder %s4419_s1, %s3671_s15 }
 0x10e   : > { %p3668_p10 = pnand %p3666_p3, %p4215_p7  ;;  %p3674_p12 = scmp.lt.s32.totalorder %s3672_s27, %s3665_s0 }
 0x110   : > { %p3669_p4 = pneg %p3668_p10  ;;  %p3675_p0 = por %p3674_p12, %p3673_p1 }
 0x112   : > { %p3676_p5 = pnand %p3675_p0, %p3669_p4 }
 0x114   : > { %3679 = shalt.err (!%p3676_p5)
}
 0x115   : > { %3224 = dma.hbm_to_vmem [thread:$0]  (!%p4198_p9), %s4416_s23, 1024, %s4419_s1, %s4160_s28, %s5045_s10, %s5045_s10, %s5047_s30  }
 0x116   : > { %s5105_s14 = sld [smem:[#allocation46_spill]]  ;;  %s784_s0 = scalar_lea.vmem [#allocation14], %s4192_s29 }
 0x117   : > { %s791_s16 = sshll.u32 %s784_s0, 4  ;;  %s4453_s16 = int_to_ptr.vmem [resolvable:$true] %s791_s16 }
 0x11c   : > { %s4450_s5 = scalar_lea.hbm %s5105_s14, %s4190_s2  ;;  %s3685_s1 = scalar_lea.hbm %s5105_s14, 2048 }
 0x11d   : > { %s3680_s15 = scalar_lea.hbm %s4450_s5, 1024  ;;  %p3686_p11 = scmp.lt.u32.totalorder %s4450_s5, %s5105_s14 }
 0x11e   : > { %p3681_p6 = scmp.ne.s32.totalorder %s4450_s5, %s3680_s15  ;;  %p3687_p13 = scmp.lt.u32.totalorder %s3685_s1, %s3680_s15 }
 0x11f   : > { %p3689_p10 = scmp.lt.u32.totalorder %s3680_s15, %s4450_s5 }
 0x120   : > { %p3683_p8 = pnand %p3681_p6, %p4215_p7  ;;  %p3688_p3 = por %p3687_p13, %p3686_p11 }
 0x122   : > { %p3684_p2 = pneg %p3683_p8  ;;  %p3690_p4 = por %p3689_p10, %p3688_p3 }
 0x124   : > { %p3691_p1 = pnand %p3690_p4, %p3684_p2 }
 0x126   : > { %3694 = shalt.err (!%p3691_p1)
}
 0x127   : > { %s3695_s0 = scalar_lea.vmem %s4453_s16, 1024  ;;  %s3942_s27 = smov [#allocation14]  }
 0x128   : > { %p3696_p12 = scmp.ne.s32.totalorder %s4453_s16, %s3695_s0  ;;  %s3700_s23 = sshll.u32 %s3942_s27, 4  ;;  %s3701_s23 = int_to_ptr.vmem [resolvable:$false] %s3700_s23 }
 0x129   : > { %s3702_s19 = scalar_lea.vmem %s3701_s23, 2048  ;;  %p3703_p6 = scmp.lt.s32.totalorder %s4453_s16, %s3701_s23 }
 0x12a   : > { %p3698_p0 = pnand %p3696_p12, %p4215_p7  ;;  %p3704_p8 = scmp.lt.s32.totalorder %s3702_s19, %s3695_s0 }
 0x12c   : > { %p3699_p5 = pneg %p3698_p0  ;;  %p3705_p11 = por %p3704_p8, %p3703_p6 }
 0x12e   : > { %p3706_p13 = pnand %p3705_p11, %p3699_p5 }
 0x130   : > { %3709 = shalt.err (!%p3706_p13)
}
 0x131   : > { %3227 = dma.hbm_to_vmem [thread:$0]  (!%p4198_p9), %s4450_s5, 1024, %s4453_s16, %s4160_s28, %s5045_s10, %s5045_s10, %s5047_s30  }
 0x132   : > { %s5106_s4 = sld [smem:[#allocation47_spill]]  ;;  %s805_s0 = scalar_lea.vmem [#allocation15], %s4192_s29 }
 0x133   : > { %s812_s23 = sshll.u32 %s805_s0, 4  ;;  %s4487_s23 = int_to_ptr.vmem [resolvable:$true] %s812_s23 }
 0x138   : > { %s4484_s27 = scalar_lea.hbm %s5106_s4, %s4190_s2  ;;  %s3715_s16 = scalar_lea.hbm %s5106_s4, 2048 }
 0x139   : > { %s3710_s19 = scalar_lea.hbm %s4484_s27, 1024  ;;  %p3716_p4 = scmp.lt.u32.totalorder %s4484_s27, %s5106_s4 }
 0x13a   : > { %p3711_p2 = scmp.ne.s32.totalorder %s4484_s27, %s3710_s19  ;;  %p3717_p1 = scmp.lt.u32.totalorder %s3715_s16, %s3710_s19 }
 0x13b   : > { %p3719_p0 = scmp.lt.u32.totalorder %s3710_s19, %s4484_s27 }
 0x13c   : > { %p3713_p3 = pnand %p3711_p2, %p4215_p7  ;;  %p3718_p12 = por %p3717_p1, %p3716_p4 }
 0x13e   : > { %p3714_p10 = pneg %p3713_p3  ;;  %p3720_p5 = por %p3719_p0, %p3718_p12 }
 0x140   : > { %p3721_p6 = pnand %p3720_p5, %p3714_p10 }
 0x142   : > { %3724 = shalt.err (!%p3721_p6)
}
 0x143   : > { %s3725_s0 = scalar_lea.vmem %s4487_s23, 1024  ;;  %s3943_s6 = smov [#allocation15]  }
 0x144   : > { %p3726_p8 = scmp.ne.s32.totalorder %s4487_s23, %s3725_s0  ;;  %s3730_s5 = sshll.u32 %s3943_s6, 4  ;;  %s3731_s5 = int_to_ptr.vmem [resolvable:$false] %s3730_s5 }
 0x145   : > { %s3732_s15 = scalar_lea.vmem %s3731_s5, 2048  ;;  %p3733_p2 = scmp.lt.s32.totalorder %s4487_s23, %s3731_s5 }
 0x146   : > { %p3728_p11 = pnand %p3726_p8, %p4215_p7  ;;  %p3734_p3 = scmp.lt.s32.totalorder %s3732_s15, %s3725_s0 }
 0x148   : > { %p3729_p13 = pneg %p3728_p11  ;;  %p3735_p4 = por %p3734_p3, %p3733_p2 }
 0x14a   : > { %p3736_p1 = pnand %p3735_p4, %p3729_p13 }
 0x14c   : > { %3739 = shalt.err (!%p3736_p1)
}
 0x14d   : > { %s5107_s19 = sld [smem:[#allocation24_spill]]  ;;  %s5108_s16 = sld [smem:[#allocation22_spill]] }
 0x14e   : > { %s5109_s1 = sld [smem:[#allocation23_spill]]  ;;  %s4515_s0 = sadd.s32 4294967295, %s3928_s3  }
 0x14f   : > { %3230 = dma.hbm_to_vmem [thread:$0]  (!%p4198_p9), %s4484_s27, 1024, %s4487_s23, %s4160_s28, %s5045_s10, %s5045_s10, %s5047_s30  }
 0x150   : > { %s2708_s6 = sadd.s32 4294967294, %s3928_s3   ;;  %p5050_p12 = scmp.eq.s32.totalorder %s4515_s0, 0 }
 0x151   : > { %p540_p5 = scmp.eq.s32.totalorder %s4515_s0, 3  ;;  %p546_p6 = scmp.eq.s32.totalorder %s2708_s6, 3 }
 0x152   : > { %p2709_p4 = scmp.ge.s32.totalorder %s3928_s3, 1  ;;  %p553_p1 = scmp.lt.s32.totalorder %s3928_s3, 5 }
 0x153   : > { %p68_p10 = scmp.ne.s32.totalorder %s5107_s19, %s3900_s21  ;;  %p5112_p13 = scmp.ne.s32.totalorder %s3908_s22, %s5107_s19 }
 0x154   : > { %p188_p0 = scmp.ne.s32.totalorder %s5109_s1, %s5108_s16  ;;  %p4549_p9 = pnand %p2709_p4, %p553_p1 }
 0x155   : > { %p4526_p8 = por %p5050_p12, %p68_p10  ;;  %p4539_p2 = por %p540_p5, %p5112_p13 }
 0x156   : > { %p4532_p11 = por %p188_p0, %p5050_p12  ;;  %p4543_p3 = por %p546_p6, %p68_p10 }
 0x157   : > { %s5110_s5 = scalar_select %p4526_p8, 1, 0 }
 0x158   : > { %s5111_s27 = scalar_select %p4532_p11, 1, 0 }
 0x159   : > { %s5113_s23 = scalar_select %p4539_p2, 1, 0 }
 0x15a   : > { %s5114_s15 = scalar_select %p4543_p3, 1, 0 }
 0x15b   : > { %s5115_s16 = scalar_select %p4549_p9, 1, 0 }
 0x15c   : > { %s3944_s1 = smov [#allocation5]   ;;  %p3196_p0 = pneg %p4549_p9 }
 0x15d   : > { %s565_s6 = sshll.u32 %s3944_s1, 4  ;;  %s5116_s30 = sld [smem:[#allocation48_spill]]  ;;  %s4561_s6 = int_to_ptr.vmem [resolvable:$true] %s565_s6 }
 0x15e   : > { %s826_s8 = scalar_lea.vmem [#allocation16], %s4192_s29  ;;  %p4566_p10 = pnand %p3196_p0, %p5050_p12 }
 0x15f   : > { %s833_s11 = sshll.u32 %s826_s8, 4  ;;  %s4570_s11 = int_to_ptr.vmem [resolvable:$true] %s833_s11 }
 0x163   : > { %s5117_s4 = smov %s5116_s30  ;;  %s4559_s7 = scalar_lea.hbm %s5116_s30, %s4190_s2 }
 0x164   : > { %s3740_s1 = scalar_lea.hbm %s4559_s7, 1024  ;;  %s3745_s30 = scalar_lea.hbm %s5117_s4, 2048 }
 0x165   : > { %p3741_p5 = scmp.ne.s32.totalorder %s4559_s7, %s3740_s1  ;;  %p3746_p4 = scmp.lt.u32.totalorder %s4559_s7, %s5117_s4 }
 0x166   : > { %p3747_p1 = scmp.lt.u32.totalorder %s3745_s30, %s3740_s1  ;;  %p3749_p12 = scmp.lt.u32.totalorder %s3740_s1, %s4559_s7 }
 0x167   : > { %p3743_p6 = pnand %p3741_p5, %p4215_p7 }
 0x168   : > { %p3748_p0 = por %p3747_p1, %p3746_p4 }
 0x169   : > { %p3744_p13 = pneg %p3743_p6 }
 0x16a   : > { %p3750_p3 = por %p3749_p12, %p3748_p0 }
 0x16c   : > { %p3751_p2 = pnand %p3750_p3, %p3744_p13 }
 0x16e   : > { %3754 = shalt.err (!%p3751_p2)
}
 0x16f   : > { %s3755_s8 = scalar_lea.vmem %s4570_s11, 1024  ;;  %s3945_s29 = smov [#allocation16]  }
 0x170   : > { %p3756_p5 = scmp.ne.s32.totalorder %s4570_s11, %s3755_s8  ;;  %s3760_s2 = sshll.u32 %s3945_s29, 4  ;;  %s3761_s2 = int_to_ptr.vmem [resolvable:$false] %s3760_s2 }
 0x171   : > { %s3762_s13 = scalar_lea.vmem %s3761_s2, 2048  ;;  %p3763_p8 = scmp.lt.s32.totalorder %s4570_s11, %s3761_s2 }
 0x172   : > { %p3758_p6 = pnand %p3756_p5, %p4215_p7  ;;  %p3764_p9 = scmp.lt.s32.totalorder %s3762_s13, %s3755_s8 }
 0x174   : > { %p3759_p11 = pneg %p3758_p6  ;;  %p3765_p4 = por %p3764_p9, %p3763_p8 }
 0x176   : > { %p3766_p1 = pnand %p3765_p4, %p3759_p11 }
 0x178   : > { %3769 = shalt.err (!%p3766_p1)
}
 0x179   : > { %p5119_p12 = scmp.ne.s32.totalorder %s5096_s9, 0  ;;  %s5120_s1 = smov 4  }
 0x17a   : > { %s5121_s10 = smov 64   ;;  %s5122_s19 = sld [smem:[#allocation33_spill]] }
 0x17b   : > { %3233 = dma.hbm_to_vmem [thread:$0]  (!%p5119_p12), %s4559_s7, 1024, %s4570_s11, %s4160_s28, %s5121_s10, %s5121_s10, %s5120_s1  }
 0x17c   : > { %p3772_p7 = pneg %p4566_p10 }
 0x180   : > { %s3770_s29 = scalar_lea.hbm %s5122_s19, 128 }
 0x181   : > { %p3771_p9 = scmp.ne.s32.totalorder %s5122_s19, %s3770_s29  ;;  %p3777_p2 = scmp.lt.u32.totalorder %s3770_s29, %s5122_s19 }
 0x183   : > { %p3773_p8 = pnand %p3772_p7, %p3771_p9 }
 0x185   : > { %p3774_p11 = pneg %p3773_p8 }
 0x187   : > { %p3779_p3 = pnand %p3777_p2, %p3774_p11 }
 0x189   : > { %3782 = shalt.err (!%p3779_p3)
}
 0x18a   : > { %s3783_s7 = scalar_lea.vmem %s4561_s6, 128  ;;  %p3791_p6 = scmp.lt.s32.totalorder %s4561_s6, %s4561_s6 }
 0x18b   : > { %p3784_p13 = scmp.ne.s32.totalorder %s4561_s6, %s3783_s7  ;;  %p3792_p4 = scmp.lt.s32.totalorder %s3783_s7, %s3783_s7 }
 0x18d   : > { %p3786_p0 = pnand %p3784_p13, %p3772_p7  ;;  %p3793_p1 = por %p3792_p4, %p3791_p6 }
 0x18f   : > { %p3787_p5 = pneg %p3786_p0 }
 0x191   : > { %p3794_p12 = pnand %p3793_p1, %p3787_p5 }
 0x193   : > { %3797 = shalt.err (!%p3794_p12)
}
 0x194   : > { %3199 = dma.hbm_to_vmem [thread:$0]  (!%p4566_p10), %s5122_s19, 128, %s4561_s6, [#allocation6], %s5121_s10, %s5121_s10, %s5120_s1  }
 0x195   : > { %p5123_p9 = scmp.ne.s32.totalorder %s5115_s16, 0 }
 0x196   : > { %s5124_s4 = sld [smem:[#allocation24_spill]] (!%p5123_p9)  ;;  %s847_s13 = sand.u32 (!%p5123_p9), 1, %s4515_s0  }
 0x197   : > { %845 = sbr.rel (%p5123_p9) target bundleno = 3843 (0xf03), region = 96  ;;  %s848_s12 = scalar_lea.sflag (!%p5123_p9), [#allocation3], %s847_s13 }
 0x198   : > { %p5125_p7 = scmp.ne.s32.totalorder (!%p5123_p9), %s5110_s5, 0 }
 0x19c   : > { %s5056_s17 = sand.u32 (!%p5123_p9), 1, %s5124_s4  }
 0x19d   : > { %s4627_s30 = sshll.u32 (!%p5123_p9), %s5056_s17, 4 }
 0x19e   : > { %s851_s29 = scalar_lea.vmem [#allocation2], %s4627_s30 }
 0x19f   : > { %3871 = dma.done.wait (%p5125_p7), %s848_s12, 256  }
 0x1a0   : > { %3873 = vsyncadd (%p5125_p7), %s848_s12, 4294967040  ;;  %p5126_p10 = scmp.eq.s32.totalorder %s4515_s0, 0 }
 0x1a2   : > { %3875 = dma.done.wait (%p5126_p10), [#allocation6], 128   ;;  %p5127_p8 = pmov %p5126_p10 }
 0x1a3   : > { %s5128_s16 = sld [smem:[#allocation23_spill]]  ;;  %p5129_p11 = scmp.ne.s32.totalorder %s5111_s27, 0 }
 0x1a4   : > { %3877 = vsyncadd (%p5127_p8), [#allocation6], 4294967168 }
 0x1a9   : > { %s862_s6 = sand.u32 1, %s5128_s16  }
 0x1aa   : > { %s2748_s1 = sshll.u32 %s862_s6, 6 }
 0x1ab   : > { %s4639_s10 = scalar_lea.vmem [#allocation7], %s2748_s1 }
 0x1ac   : > { %3879 = dma.done.wait (%p5129_p11), %s848_s12, 10240  }
 0x1ad   : > { %3881 = vsyncadd (%p5129_p11), %s848_s12, 4294957056  ;;  %s5130_s2 = sld [smem:[#allocation25_spill]]  ;;  %s5131_s8 = sld [smem:[#allocation35_spill]] }
 0x1ae   : > { %s5132_s4 = sld [smem:[#allocation36_spill]]  ;;  %s5133_s16 = sld [smem:[#allocation41_spill]] }
 0x1af   : > { %s5134_s19 = sld [smem:[#allocation42_spill]]  ;;  %s4665_s24 = scalar_lea.vmem [#allocation8], %s2748_s1 }
 0x1b0   : > { %s4667_s26 = scalar_lea.vmem [#allocation9], %s2748_s1  ;;  %s4669_s0 = scalar_lea.vmem [#allocation10], %s2748_s1 }
 0x1b1   : > { %s4671_s9 = scalar_lea.vmem [#allocation11], %s2748_s1  ;;  %s4675_s11 = scalar_lea.vmem [#allocation13], %s2748_s1 }
 0x1b2   : > { %s4677_s28 = scalar_lea.vmem [#allocation14], %s2748_s1  ;;  %s4681_s27 = scalar_lea.vmem [#allocation16], %s2748_s1 }
 0x1b3   : > { %p1063_p2 = scmp.lt.s32.totalorder %s5130_s2, 1  ;;  %s4684_s14 = scalar_lea.vmem [#allocation17], %s4627_s30 }
 0x1b4   : > { %p2759_p3 = scmp.ne.s32.totalorder %s5130_s2, 0 }
 0x1b5   : > { %s4647_s5 = scalar_select %p1063_p2, %s5130_s2, 1 }
 0x1b6   : > { %1080 = sbr.rel (%p2759_p3) target bundleno = 445 (0x1bd), region = 148  ;;  %v1081_v0 = vld [vmem:[%s851_s29] sm:$0xff] (!%p2759_p3)  ;;  %v1082_v1 = vld [vmem:[%s851_s29 + $0x8] sm:$0xff] (!%p2759_p3) }
 0x1b7   : > { %s1065_s7 = scalar_lea.vmem %s5131_s8, %s4647_s5  ;;  %s1068_s13 = scalar_lea.vmem %s5132_s4, %s4647_s5  ;;  %1083 = vst [vmem:[%s4684_s14] sm:$0xff] (!%p2759_p3), %v1081_v0  ;;  %1084 = vst [vmem:[%s4684_s14 + $0x8] sm:$0xff] (!%p2759_p3), %v1082_v1 }
 0x1b8   : > { %s1071_s6 = scalar_lea.vmem %s5133_s16, %s4647_s5  ;;  %s1074_s25 = scalar_lea.vmem %s5134_s19, %s4647_s5 }
 0x1b9   : > { %s4673_s8 = scalar_lea.vmem [#allocation12], %s2748_s1  ;;  %s4679_s4 = scalar_lea.vmem [#allocation15], %s2748_s1 }
 0x1bd PF: > { %v3339_v4 = vld [vmem:[%s4639_s10] sm:$0xff]   ;;  %v3946_v5 = vmov 0.0   ;;  %s5135_s30 = sld [smem:[#allocation34_spill]]  ;;  %v3340_v17 = vld [vmem:[%s4639_s10 + $0x8] sm:$0xff]   ;;  %v3341_v18 = vld [vmem:[%s4639_s10 + $0x10] sm:$0xff]   ;;  %vm3947_vm0 = vmmov 0  }
 0x1be   : > { %v4690_v2 = vld [vmem:[%s4684_s14] sm:$0xff]  ;;  %v4693_v3 = vld [vmem:[%s4684_s14 + $0x8] sm:$0xff]  ;;  %2962 = vmatprep.subr.bf16.mxu0 %v3946_v5  ;;  %2982 = vmatprep.subr.bf16.mxu1 %v3946_v5  ;;  %vm1356_vm1 = vcmask 130048  }
 0x1bf   : > { %1090 = vadd.xlane.f32.xlu0 %v4690_v2  ;;  %2963 = vmatpush3.bf16.msra.mxu0 %v3339_v4  ;;  %v3342_v19 = vld [vmem:[%s4639_s10 + $0x18] sm:$0xff]   ;;  %v3343_v20 = vld [vmem:[%s4639_s10 + $0x20] sm:$0xff]   ;;  %v3344_v21 = vld [vmem:[%s4639_s10 + $0x28] sm:$0xff]  }
 0x1c0   : > { %2964 = vmatprep.subr.bf16.mxu0 %v3946_v5  ;;  %2978 = vmatprep.mubr.msk.bf16.mxu0 %vm3947_vm0, %v3946_v5  ;;  %v3345_v22 = vld [vmem:[%s4639_s10 + $0x30] sm:$0xff]   ;;  %v3346_v23 = vld [vmem:[%s4639_s10 + $0x38] sm:$0xff]   ;;  %v3347_v24 = vld [vmem:[%s4665_s24] sm:$0xff]  }
 0x1c1   : > { %2998 = vmatprep.mubr.msk.bf16.mxu1 %vm3947_vm0, %v3946_v5  ;;  %2983 = vmatpush3.bf16.msra.mxu1 %v3347_v24  ;;  %v3348_v25 = vld [vmem:[%s4665_s24 + $0x8] sm:$0xff]   ;;  %v3349_v26 = vld [vmem:[%s4665_s24 + $0x10] sm:$0xff]   ;;  %v3350_v27 = vld [vmem:[%s4665_s24 + $0x18] sm:$0xff]  }
 0x1c2   : > { %2984 = vmatprep.subr.bf16.mxu1 %v3946_v5  ;;  %v3351_v28 = vld [vmem:[%s4665_s24 + $0x20] sm:$0xff]   ;;  %v3352_v29 = vld [vmem:[%s4665_s24 + $0x28] sm:$0xff]   ;;  %v3353_v30 = vld [vmem:[%s4665_s24 + $0x30] sm:$0xff]  }
 0x1c3   : > { %1092 = vadd.xlane.f32.xlu0 %v4693_v3  ;;  %v4704_v8 = vld [vmem:[%s5135_s30] ss:$0 sm:$0xff]  ;;  %2965 = vmatpush3.bf16.msra.mxu0 %v3340_v17  ;;  %v3356_v54 = vld [vmem:[%s4667_s26] sm:$0xff]   ;;  %v3357_v55 = vld [vmem:[%s4667_s26 + $0x8] sm:$0xff]  }
 0x1c4   : > { %2966 = vmatprep.subr.bf16.mxu0 %v3946_v5  ;;  %v2761_v39 = vld [vmem:[%s1065_s7] ss:$0 sm:$0xff]  ;;  %v3358_v56 = vld [vmem:[%s4667_s26 + $0x10] sm:$0xff]   ;;  %v3360_v58 = vld [vmem:[%s4667_s26 + $0x20] sm:$0xff]  }
 0x1c5   : > { %2985 = vmatpush3.bf16.msra.mxu1 %v3348_v25  ;;  %v2762_v43 = vld [vmem:[%s1068_s13] ss:$0 sm:$0xff]  ;;  %v3361_v59 = vld [vmem:[%s4667_s26 + $0x28] sm:$0xff]   ;;  %v3362_v60 = vld [vmem:[%s4667_s26 + $0x30] sm:$0xff]  }
 0x1c6   : > { %2986 = vmatprep.subr.bf16.mxu1 %v3946_v5  ;;  %v3354_v48 = vld [vmem:[%s4665_s24 + $0x38] sm:$0xff]  }
 0x1c7   : > { %2967 = vmatpush3.bf16.msra.mxu0 %v3341_v18  ;;  %v3359_v57 = vld [vmem:[%s4667_s26 + $0x18] sm:$0xff]  }
 0x1c8   : > { %2968 = vmatprep.subr.bf16.mxu0 %v3946_v5  ;;  %v3355_v4 = vld [vmem:[#allocation5] sm:$0xff]  }
 0x1c9   : > { %2987 = vmatpush3.bf16.msra.mxu1 %v3349_v26 }
 0x1ca   : > { %2988 = vmatprep.subr.bf16.mxu1 %v3946_v5 }
 0x1cb   : > { %2969 = vmatpush3.bf16.msra.mxu0 %v3342_v19 }
 0x1cc   : > { %2970 = vmatprep.subr.bf16.mxu0 %v3946_v5 }
 0x1cd   : > { %2989 = vmatpush3.bf16.msra.mxu1 %v3350_v27 }
 0x1ce   : > { %2990 = vmatprep.subr.bf16.mxu1 %v3946_v5 }
 0x1cf   : > { %2971 = vmatpush3.bf16.msra.mxu0 %v3343_v20  ;;  %v3371_v20 = vld [vmem:[%s4669_s0 + $0x38] sm:$0xff]  }
 0x1d0   : > { %2972 = vmatprep.subr.bf16.mxu0 %v3946_v5 }
 0x1d1   : > { %2991 = vmatpush3.bf16.msra.mxu1 %v3351_v28 }
 0x1d2   : > { %2992 = vmatprep.subr.bf16.mxu1 %v3946_v5 }
 0x1d3   : > { %2973 = vmatpush3.bf16.msra.mxu0 %v3344_v21 }
 0x1d4   : > { %2974 = vmatprep.subr.bf16.mxu0 %v3946_v5 }
 0x1d5   : > { %2993 = vmatpush3.bf16.msra.mxu1 %v3352_v29 }
 0x1d6   : > { %2994 = vmatprep.subr.bf16.mxu1 %v3946_v5 }
 0x1d7   : > { %2975 = vmatpush3.bf16.msra.mxu0 %v3345_v22 }
 0x1d8   : > { %2976 = vmatprep.subr.bf16.mxu0 %v3946_v5 }
 0x1d9   : > { %2995 = vmatpush3.bf16.msra.mxu1 %v3353_v30 }
 0x1da   : > { %2996 = vmatprep.subr.bf16.mxu1 %v3946_v5 }
 0x1db   : > { %2977 = vmatpush3.bf16.msra.mxu0 %v3346_v23 }
 0x1dc   : > { %3002 = vmatprep.subr.bf16.mxu0 %v3946_v5 }
 0x1dd   : > { %2997 = vmatpush3.bf16.msra.mxu1 %v3354_v48  ;;  %v3380_v48 = vld [vmem:[%s4673_s8] sm:$0xff]  }
 0x1de   : > { %3008 = vmatprep.subr.bf16.mxu1 %v3946_v5 }
 0x24c   : > { %v1091_v6 = vpop.xlane.xlu0 %1090 }
 0x24d   : > { %v1094_v7 = vmul.f32 0.020833334, %v1091_v6  ;;  %v3363_v6 = vld [vmem:[%s4667_s26 + $0x38] sm:$0xff]  }
 0x24f   : > { %v1096_v9 = vsub.f32 %v4690_v2, %v1094_v7  ;;  %v3364_v7 = vld [vmem:[%s4669_s0] sm:$0xff]  }
 0x250   : > { %v1093_v10 = vpop.xlane.xlu0 %1092 }
 0x251   : > { %v1095_v11 = vmul.f32 0.020833334, %v1093_v10  ;;  %v1104_v12 = vmul.f32 %v4704_v8, %v1096_v9  ;;  %v3365_v9 = vld [vmem:[%s4669_s0 + $0x8] sm:$0xff]   ;;  %v3366_v10 = vld [vmem:[%s4669_s0 + $0x10] sm:$0xff]  }
 0x253   : > { %v1097_v13 = vsub.f32 %v4693_v3, %v1095_v11  ;;  %v1106_v14 = vmul.f32 %v1104_v12, %v1104_v12  ;;  %v3367_v11 = vld [vmem:[%s4669_s0 + $0x18] sm:$0xff]  }
 0x255   : > { %1108 = vadd.xlane.f32.xlu1 %v1106_v14  ;;  %v1105_v15 = vmul.f32 %v4704_v8, %v1097_v13  ;;  %v3369_v13 = vld [vmem:[%s4669_s0 + $0x28] sm:$0xff]   ;;  %v3370_v14 = vld [vmem:[%s4669_s0 + $0x30] sm:$0xff]  }
 0x257   : > { %v1107_v16 = vmul.f32 %v1105_v15, %v1105_v15 }
 0x259   : > { %1110 = vadd.xlane.f32.xlu1 %v1107_v16 }
 0x2e2   : > { %v1109_v31 = vpop.xlane.xlu1 %1108 }
 0x2e3   : > { %v1112_v32 = vmul.f32 0.020833334, %v1109_v31 }
 0x2e5   : > { %v1114_v33 = vadd.f32 1e-05, %v1112_v32  ;;  %v3372_v32 = vld [vmem:[%s4671_s9] sm:$0xff]  }
 0x2e6   : > { %v1111_v34 = vpop.xlane.xlu1 %1110 }
 0x2e7   : > { %3420 = vrsqrt.f32 %v1114_v33  ;;  %v1113_v35 = vmul.f32 0.020833334, %v1111_v34  ;;  %v3373_v33 = vld [vmem:[%s4671_s9 + $0x8] sm:$0xff]  }
 0x2e9   : > { %v1115_v36 = vadd.f32 1e-05, %v1113_v35 }
 0x2eb   : > { %3422 = vrsqrt.f32 %v1115_v36 }
 0x2f1   : > { %v3421_v37 = vpop.eup %3420 }
 0x2f2   : > { %v1118_v38 = vmul.f32 %v3421_v37, %v1104_v12  ;;  %v3368_v12 = vld [vmem:[%s4669_s0 + $0x20] sm:$0xff]  }
 0x2f4   : > { %v1126_v42 = vmul.f32 %v2761_v39, %v1118_v38 }
 0x2f5   : > { %v3423_v40 = vpop.eup %3422 }
 0x2f6   : > { %v1119_v41 = vmul.f32 %v3423_v40, %v1105_v15  ;;  %v1134_v45 = vadd.f32 %v2762_v43, %v1126_v42  ;;  %v3374_v42 = vld [vmem:[%s4671_s9 + $0x10] sm:$0xff]  }
 0x2f8   : > { %v1127_v44 = vmul.f32 %v2761_v39, %v1119_v41 }
 0x2fa   : > { %v1135_v46 = vadd.f32 %v2762_v43, %v1127_v44  ;;  %v3375_v43 = vld [vmem:[%s4671_s9 + $0x18] sm:$0xff]   ;;  %v3376_v44 = vld [vmem:[%s4671_s9 + $0x20] sm:$0xff]  }
 0x2fc   : > { %v1136_v47 = vpack.c.bf16 %v1135_v46, %v1134_v45  ;;  %v3377_v45 = vld [vmem:[%s4671_s9 + $0x28] sm:$0xff]   ;;  %v3378_v46 = vld [vmem:[%s4671_s9 + $0x30] sm:$0xff]  }
 0x2fe   : > { %2979 = vmatmul.mubr.bf16.vlgmr.msra.gmra.mrb[0].mxu0 %v1136_v47  ;;  %v3379_v47 = vld [vmem:[%s4671_s9 + $0x38] sm:$0xff]  }
 0x2ff   : > { %3004 = vmatprep.mubr.msk.bf16.mxu0 %vm3947_vm0, %v3946_v5 }
 0x3d1   : > { %v1235_v49 = vpop.f32.mrb[0].mxu0 }
 0x3d2   : > { %v2980_v50 = vpop.f32.mrb[1].mxu0 }
 0x3d3   : > { %v1238_v51 = vpop.f32.mrb[2].mxu0  ;;  %v3382_v50 = vld [vmem:[%s4673_s8 + $0x10] sm:$0xff]  }
 0x3d4   : > { %v1242_v52 = vpack.c.bf16 %v1238_v51, %v1235_v49  ;;  %v2981_v53 = vpop.f32.mrb[3].mxu0  ;;  %v3381_v49 = vld [vmem:[%s4673_s8 + $0x8] sm:$0xff]   ;;  %v3383_v51 = vld [vmem:[%s4673_s8 + $0x18] sm:$0xff]  }
 0x3d5   : > { %v3385_v53 = vld [vmem:[%s4673_s8 + $0x28] sm:$0xff]  }
 0x3d6   : > { %2999 = vmatmul.mubr.bf16.vlgmr.msra.gmra.mrb[0].mxu1 %v1242_v52  ;;  %v3384_v52 = vld [vmem:[%s4673_s8 + $0x20] sm:$0xff]  }
 0x3d7   : > { %3024 = vmatprep.mubr.msk.bf16.mxu1 %vm3947_vm0, %v3946_v5  ;;  %3009 = vmatpush3.bf16.msra.mxu1 %v3356_v54  ;;  %v3386_v54 = vld [vmem:[%s4673_s8 + $0x30] sm:$0xff]  }
 0x3d8   : > { %3010 = vmatprep.subr.bf16.mxu1 %v3946_v5 }
 0x3db   : > { %3011 = vmatpush3.bf16.msra.mxu1 %v3357_v55 }
 0x3dc   : > { %3012 = vmatprep.subr.bf16.mxu1 %v3946_v5 }
 0x3df   : > { %3013 = vmatpush3.bf16.msra.mxu1 %v3358_v56 }
 0x3e0   : > { %3014 = vmatprep.subr.bf16.mxu1 %v3946_v5 }
 0x3e3   : > { %3015 = vmatpush3.bf16.msra.mxu1 %v3359_v57 }
 0x3e4   : > { %3016 = vmatprep.subr.bf16.mxu1 %v3946_v5 }
 0x3e7   : > { %3017 = vmatpush3.bf16.msra.mxu1 %v3360_v58 }
 0x3e8   : > { %3018 = vmatprep.subr.bf16.mxu1 %v3946_v5 }
 0x3eb   : > { %3019 = vmatpush3.bf16.msra.mxu1 %v3361_v59 }
 0x3ec   : > { %3020 = vmatprep.subr.bf16.mxu1 %v3946_v5 }
 0x3ef   : > { %3021 = vmatpush3.bf16.msra.mxu1 %v3362_v60 }
 0x3f0   : > { %3022 = vmatprep.subr.bf16.mxu1 %v3946_v5 }
 0x3f3   : > { %3023 = vmatpush3.bf16.msra.mxu1 %v3363_v6  ;;  %v2798_v6 = vld [vmem:[%s1074_s25] ss:$0 sm:$0xff]  ;;  %s5140_s25 = sld [smem:[#allocation25_spill]] }
 0x3f4   : > { %3048 = vmatprep.subr.bf16.mxu1 %v3946_v5 }
 0x3f9   : > { %p2849_p13 = scmp.ge.s32.totalorder %s5140_s25, 1 }
 0x4a9   : > { %v1341_v61 = vpop.f32.mrb[0].mxu1 }
 0x4aa   : > { %v3000_v62 = vpop.f32.mrb[1].mxu1 }
 0x4ab   : > { %v1344_v63 = vpop.f32.mrb[2].mxu1  ;;  %v2797_v62 = vld [vmem:[%s1071_s6] ss:$0 sm:$0xff] }
 0x4ac   : > { %v1348_v0 = vpack.c.bf16 %v1344_v63, %v1341_v61  ;;  %v3001_v1 = vpop.f32.mrb[3].mxu1 }
 0x4ae   : > { %3003 = vmatpush3.bf16.msra.mxu0 %v1348_v0 }
 0x4af   : > { %3028 = vmatprep.subr.bf16.mxu0 %v3946_v5 }
 0x4b1   : > { %3005 = vmatmul.mubr.msk.bf16.vlgmr.msra.gmra.mrb[4].mxu0 %vm1356_vm1, %v3355_v4 }
 0x4b2   : > { %3044 = vmatprep.mubr.msk.bf16.mxu0 %vm3947_vm0, %v3946_v5  ;;  %3029 = vmatpush3.bf16.msra.mxu0 %v3364_v7 }
 0x4b3   : > { %3030 = vmatprep.subr.bf16.mxu0 %v3946_v5 }
 0x4b6   : > { %3031 = vmatpush3.bf16.msra.mxu0 %v3365_v9 }
 0x4b7   : > { %3032 = vmatprep.subr.bf16.mxu0 %v3946_v5 }
 0x4ba   : > { %3033 = vmatpush3.bf16.msra.mxu0 %v3366_v10 }
 0x4bb   : > { %3034 = vmatprep.subr.bf16.mxu0 %v3946_v5 }
 0x4be   : > { %3035 = vmatpush3.bf16.msra.mxu0 %v3367_v11 }
 0x4bf   : > { %3036 = vmatprep.subr.bf16.mxu0 %v3946_v5 }
 0x4c2   : > { %3037 = vmatpush3.bf16.msra.mxu0 %v3368_v12  ;;  %v3387_v12 = vld [vmem:[%s4673_s8 + $0x38] sm:$0xff]  }
 0x4c3   : > { %3038 = vmatprep.subr.bf16.mxu0 %v3946_v5 }
 0x4c6   : > { %3039 = vmatpush3.bf16.msra.mxu0 %v3369_v13 }
 0x4c7   : > { %3040 = vmatprep.subr.bf16.mxu0 %v3946_v5 }
 0x4ca   : > { %3041 = vmatpush3.bf16.msra.mxu0 %v3370_v14 }
 0x4cb   : > { %3042 = vmatprep.subr.bf16.mxu0 %v3946_v5 }
 0x4ce   : > { %3043 = vmatpush3.bf16.msra.mxu0 %v3371_v20  ;;  %v3390_v20 = vld [vmem:[%s4675_s11 + $0x10] sm:$0xff]  }
 0x4cf   : > { %3068 = vmatprep.subr.bf16.mxu0 %v3946_v5 }
 0x584   : > { %v1394_v15 = vpop.f32.mrb[4].mxu0 }
 0x585   : > { %v3006_v16 = vpop.f32.mrb[5].mxu0 }
 0x586   : > { %v1397_v17 = vpop.f32.mrb[6].mxu0 }
 0x587   : > { %v1401_v18 = vpack.c.bf16 %v1397_v17, %v1394_v15  ;;  %v3007_v19 = vpop.f32.mrb[7].mxu0 }
 0x588   : > { %v3389_v19 = vld [vmem:[%s4675_s11 + $0x8] sm:$0xff]  }
 0x589   : > { %3025 = vmatmul.mubr.bf16.vlgmr.msra.gmra.mrb[4].mxu1 %v1401_v18  ;;  %v3388_v18 = vld [vmem:[%s4675_s11] sm:$0xff]  }
 0x58a   : > { %3064 = vmatprep.mubr.msk.bf16.mxu1 %vm3947_vm0, %v3946_v5  ;;  %3049 = vmatpush3.bf16.msra.mxu1 %v3372_v32  ;;  %v3400_v32 = vld [vmem:[%s4677_s28 + $0x20] sm:$0xff]  }
 0x58b   : > { %3050 = vmatprep.subr.bf16.mxu1 %v3946_v5 }
 0x58e   : > { %3051 = vmatpush3.bf16.msra.mxu1 %v3373_v33  ;;  %v3401_v33 = vld [vmem:[%s4677_s28 + $0x28] sm:$0xff]  }
 0x58f   : > { %3052 = vmatprep.subr.bf16.mxu1 %v3946_v5 }
 0x592   : > { %3053 = vmatpush3.bf16.msra.mxu1 %v3374_v42 }
 0x593   : > { %3054 = vmatprep.subr.bf16.mxu1 %v3946_v5 }
 0x596   : > { %3055 = vmatpush3.bf16.msra.mxu1 %v3375_v43 }
 0x597   : > { %3056 = vmatprep.subr.bf16.mxu1 %v3946_v5 }
 0x59a   : > { %3057 = vmatpush3.bf16.msra.mxu1 %v3376_v44 }
 0x59b   : > { %3058 = vmatprep.subr.bf16.mxu1 %v3946_v5 }
 0x59e   : > { %3059 = vmatpush3.bf16.msra.mxu1 %v3377_v45 }
 0x59f   : > { %3060 = vmatprep.subr.bf16.mxu1 %v3946_v5 }
 0x5a2   : > { %3061 = vmatpush3.bf16.msra.mxu1 %v3378_v46 }
 0x5a3   : > { %3062 = vmatprep.subr.bf16.mxu1 %v3946_v5 }
 0x5a6   : > { %3063 = vmatpush3.bf16.msra.mxu1 %v3379_v47 }
 0x5a7   : > { %3088 = vmatprep.subr.bf16.mxu1 %v3946_v5 }
 0x65c   : > { %v1500_v21 = vpop.f32.mrb[4].mxu1 }
 0x65d   : > { %v3026_v22 = vpop.f32.mrb[5].mxu1 }
 0x65e   : > { %v1503_v23 = vpop.f32.mrb[6].mxu1  ;;  %v3392_v22 = vld [vmem:[%s4675_s11 + $0x20] sm:$0xff]  }
 0x65f   : > { %v1507_v24 = vpack.c.bf16 %v1503_v23, %v1500_v21  ;;  %v3027_v25 = vpop.f32.mrb[7].mxu1  ;;  %v3391_v21 = vld [vmem:[%s4675_s11 + $0x18] sm:$0xff]   ;;  %v3393_v23 = vld [vmem:[%s4675_s11 + $0x28] sm:$0xff]  }
 0x660   : > { %v3395_v25 = vld [vmem:[%s4675_s11 + $0x38] sm:$0xff]  }
 0x661   : > { %3045 = vmatmul.mubr.bf16.vlgmr.msra.gmra.mrb[8].mxu0 %v1507_v24  ;;  %v3394_v24 = vld [vmem:[%s4675_s11 + $0x30] sm:$0xff]  }
 0x662   : > { %3084 = vmatprep.mubr.msk.bf16.mxu0 %vm3947_vm0, %v3946_v5  ;;  %3069 = vmatpush3.bf16.msra.mxu0 %v3380_v48  ;;  %v3403_v48 = vld [vmem:[%s4677_s28 + $0x38] sm:$0xff]  }
 0x663   : > { %3070 = vmatprep.subr.bf16.mxu0 %v3946_v5 }
 0x666   : > { %3071 = vmatpush3.bf16.msra.mxu0 %v3381_v49  ;;  %v3404_v49 = vld [vmem:[%s4679_s4] sm:$0xff]  }
 0x667   : > { %3072 = vmatprep.subr.bf16.mxu0 %v3946_v5 }
 0x66a   : > { %3073 = vmatpush3.bf16.msra.mxu0 %v3382_v50  ;;  %v3405_v50 = vld [vmem:[%s4679_s4 + $0x8] sm:$0xff]  }
 0x66b   : > { %3074 = vmatprep.subr.bf16.mxu0 %v3946_v5 }
 0x66e   : > { %3075 = vmatpush3.bf16.msra.mxu0 %v3383_v51  ;;  %v3406_v51 = vld [vmem:[%s4679_s4 + $0x10] sm:$0xff]  }
 0x66f   : > { %3076 = vmatprep.subr.bf16.mxu0 %v3946_v5 }
 0x672   : > { %3077 = vmatpush3.bf16.msra.mxu0 %v3384_v52  ;;  %v3407_v52 = vld [vmem:[%s4679_s4 + $0x18] sm:$0xff]  }
 0x673   : > { %3078 = vmatprep.subr.bf16.mxu0 %v3946_v5 }
 0x676   : > { %3079 = vmatpush3.bf16.msra.mxu0 %v3385_v53  ;;  %v3408_v53 = vld [vmem:[%s4679_s4 + $0x20] sm:$0xff]  }
 0x677   : > { %3080 = vmatprep.subr.bf16.mxu0 %v3946_v5 }
 0x67a   : > { %3081 = vmatpush3.bf16.msra.mxu0 %v3386_v54  ;;  %v3409_v54 = vld [vmem:[%s4679_s4 + $0x28] sm:$0xff]  }
 0x67b   : > { %3082 = vmatprep.subr.bf16.mxu0 %v3946_v5 }
 0x67e   : > { %3083 = vmatpush3.bf16.msra.mxu0 %v3387_v12 }
 0x67f   : > { %3108 = vmatprep.subr.bf16.mxu0 %v3946_v5 }
 0x734   : > { %v1606_v26 = vpop.f32.mrb[8].mxu0 }
 0x735   : > { %v4798_v27 = vadd.f32 %v1606_v26, %v4690_v2  ;;  %v3046_v28 = vpop.f32.mrb[9].mxu0  ;;  %v3396_v26 = vld [vmem:[%s4677_s28] sm:$0xff]  }
 0x736   : > { %v1609_v29 = vpop.f32.mrb[10].mxu0  ;;  %v3397_v28 = vld [vmem:[%s4677_s28 + $0x8] sm:$0xff]  }
 0x737   : > { %v4801_v30 = vadd.f32 %v1609_v29, %v4693_v3  ;;  %1617 = vadd.xlane.f32.xlu0 %v4798_v27  ;;  %v3047_v31 = vpop.f32.mrb[11].mxu0  ;;  %v3398_v29 = vld [vmem:[%s4677_s28 + $0x10] sm:$0xff]  }
 0x738   : > { %v3399_v31 = vld [vmem:[%s4677_s28 + $0x18] sm:$0xff]  }
 0x739   : > { %1619 = vadd.xlane.f32.xlu1 %v4801_v30 }
 0x7c4   : > { %v1618_v2 = vpop.xlane.xlu0 %1617 }
 0x7c5   : > { %v1621_v34 = vmul.f32 0.020833334, %v1618_v2  ;;  %v3402_v2 = vld [vmem:[%s4677_s28 + $0x30] sm:$0xff]  }
 0x7c6   : > { %v1620_v35 = vpop.xlane.xlu1 %1619 }
 0x7c7   : > { %v1623_v3 = vsub.f32 %v4798_v27, %v1621_v34  ;;  %v1622_v36 = vmul.f32 0.020833334, %v1620_v35 }
 0x7c9   : > { %v1624_v37 = vsub.f32 %v4801_v30, %v1622_v36  ;;  %v1625_v38 = vmul.f32 %v4704_v8, %v1623_v3 }
 0x7cb   : > { %v1627_v39 = vmul.f32 %v1625_v38, %v1625_v38  ;;  %v1626_v40 = vmul.f32 %v4704_v8, %v1624_v37 }
 0x7cd   : > { %1629 = vadd.xlane.f32.xlu0 %v1627_v39  ;;  %v1628_v41 = vmul.f32 %v1626_v40, %v1626_v40 }
 0x7cf   : > { %1631 = vadd.xlane.f32.xlu1 %v1628_v41 }
 0x85a   : > { %v1630_v55 = vpop.xlane.xlu0 %1629 }
 0x85b   : > { %v1633_v56 = vmul.f32 0.020833334, %v1630_v55  ;;  %v3410_v55 = vld [vmem:[%s4679_s4 + $0x30] sm:$0xff]  }
 0x85c   : > { %v1632_v57 = vpop.xlane.xlu1 %1631 }
 0x85d   : > { %v1635_v58 = vadd.f32 1e-05, %v1633_v56  ;;  %v1634_v59 = vmul.f32 0.020833334, %v1632_v57 }
 0x85f   : > { %3424 = vrsqrt.f32 %v1635_v58  ;;  %v1636_v60 = vadd.f32 1e-05, %v1634_v59 }
 0x861   : > { %3426 = vrsqrt.f32 %v1636_v60 }
 0x869   : > { %v3425_v61 = vpop.eup %3424 }
 0x86a   : > { %v1639_v63 = vmul.f32 %v3425_v61, %v1625_v38  ;;  %v3411_v61 = vld [vmem:[%s4679_s4 + $0x38] sm:$0xff]  }
 0x86b   : > { %v3427_v0 = vpop.eup %3426 }
 0x86c   : > { %v1640_v1 = vmul.f32 %v3427_v0, %v1626_v40  ;;  %v1647_v4 = vmul.f32 %v2797_v62, %v1639_v63  ;;  %v3413_v63 = vld [vmem:[%s4681_s27 + $0x8] sm:$0xff]   ;;  %v3414_v0 = vld [vmem:[%s4681_s27 + $0x10] sm:$0xff]  }
 0x86e   : > { %v1648_v7 = vmul.f32 %v2797_v62, %v1640_v1  ;;  %v1655_v9 = vadd.f32 %v2798_v6, %v1647_v4  ;;  %v3412_v62 = vld [vmem:[%s4681_s27] sm:$0xff]   ;;  %v3415_v1 = vld [vmem:[%s4681_s27 + $0x18] sm:$0xff]  }
 0x86f   : > { %v3416_v4 = vld [vmem:[%s4681_s27 + $0x20] sm:$0xff]  }
 0x870   : > { %v1656_v10 = vadd.f32 %v2798_v6, %v1648_v7  ;;  %v3417_v6 = vld [vmem:[%s4681_s27 + $0x28] sm:$0xff]   ;;  %v3418_v7 = vld [vmem:[%s4681_s27 + $0x30] sm:$0xff]  }
 0x872   : > { %v1657_v11 = vpack.c.bf16 %v1656_v10, %v1655_v9 }
 0x874   : > { %3065 = vmatmul.mubr.bf16.vlgmr.msra.gmra.mrb[8].mxu1 %v1657_v11 }
 0x875   : > { %3104 = vmatprep.mubr.msk.bf16.mxu1 %vm3947_vm0, %v3946_v5  ;;  %3089 = vmatpush3.bf16.msra.mxu1 %v3388_v18 }
 0x876   : > { %3090 = vmatprep.subr.bf16.mxu1 %v3946_v5 }
 0x879   : > { %3091 = vmatpush3.bf16.msra.mxu1 %v3389_v19 }
 0x87a   : > { %3092 = vmatprep.subr.bf16.mxu1 %v3946_v5 }
 0x87d   : > { %3093 = vmatpush3.bf16.msra.mxu1 %v3390_v20 }
 0x87e   : > { %3094 = vmatprep.subr.bf16.mxu1 %v3946_v5 }
 0x881   : > { %3095 = vmatpush3.bf16.msra.mxu1 %v3391_v21 }
 0x882   : > { %3096 = vmatprep.subr.bf16.mxu1 %v3946_v5 }
 0x885   : > { %3097 = vmatpush3.bf16.msra.mxu1 %v3392_v22 }
 0x886   : > { %3098 = vmatprep.subr.bf16.mxu1 %v3946_v5 }
 0x889   : > { %3099 = vmatpush3.bf16.msra.mxu1 %v3393_v23 }
 0x88a   : > { %3100 = vmatprep.subr.bf16.mxu1 %v3946_v5 }
 0x88d   : > { %3101 = vmatpush3.bf16.msra.mxu1 %v3394_v24 }
 0x88e   : > { %3102 = vmatprep.subr.bf16.mxu1 %v3946_v5 }
 0x891   : > { %3103 = vmatpush3.bf16.msra.mxu1 %v3395_v25 }
 0x892   : > { %3128 = vmatprep.subr.bf16.mxu1 %v3946_v5 }
 0x947   : > { %v1756_v13 = vpop.f32.mrb[8].mxu1 }
 0x948   : > { %v3066_v14 = vpop.f32.mrb[9].mxu1 }
 0x949   : > { %v1759_v15 = vpop.f32.mrb[10].mxu1  ;;  %v3419_v14 = vld [vmem:[%s4681_s27 + $0x38] sm:$0xff]  }
 0x94a   : > { %v1763_v16 = vpack.c.bf16 %v1759_v15, %v1756_v13  ;;  %v3067_v17 = vpop.f32.mrb[11].mxu1 }
 0x94c   : > { %3085 = vmatmul.mubr.bf16.vlgmr.msra.gmra.mrb[12].mxu0 %v1763_v16 }
 0x94d   : > { %3124 = vmatprep.mubr.msk.bf16.mxu0 %vm3947_vm0, %v3946_v5  ;;  %3109 = vmatpush3.bf16.msra.mxu0 %v3396_v26 }
 0x94e   : > { %3110 = vmatprep.subr.bf16.mxu0 %v3946_v5 }
 0x951   : > { %3111 = vmatpush3.bf16.msra.mxu0 %v3397_v28 }
 0x952   : > { %3112 = vmatprep.subr.bf16.mxu0 %v3946_v5 }
 0x955   : > { %3113 = vmatpush3.bf16.msra.mxu0 %v3398_v29 }
 0x956   : > { %3114 = vmatprep.subr.bf16.mxu0 %v3946_v5 }
 0x959   : > { %3115 = vmatpush3.bf16.msra.mxu0 %v3399_v31 }
 0x95a   : > { %3116 = vmatprep.subr.bf16.mxu0 %v3946_v5 }
 0x95d   : > { %3117 = vmatpush3.bf16.msra.mxu0 %v3400_v32 }
 0x95e   : > { %3118 = vmatprep.subr.bf16.mxu0 %v3946_v5 }
 0x961   : > { %3119 = vmatpush3.bf16.msra.mxu0 %v3401_v33 }
 0x962   : > { %3120 = vmatprep.subr.bf16.mxu0 %v3946_v5 }
 0x965   : > { %3121 = vmatpush3.bf16.msra.mxu0 %v3402_v2 }
 0x966   : > { %3122 = vmatprep.subr.bf16.mxu0 %v3946_v5 }
 0x969   : > { %3123 = vmatpush3.bf16.msra.mxu0 %v3403_v48 }
 0x96a   : > { %3148 = vmatprep.subr.bf16.mxu0 %v3946_v5 }
 0xa1f   : > { %v1862_v34 = vpop.f32.mrb[12].mxu0 }
 0xa20   : > { %v2815_v35 = vmul.f32 -1.442695, %v1862_v34  ;;  %v3086_v3 = vpop.f32.mrb[13].mxu0 }
 0xa21   : > { %v1865_v36 = vpop.f32.mrb[14].mxu0 }
 0xa22   : > { %3428 = vpow2.f32 %v2815_v35  ;;  %v2816_v37 = vmul.f32 -1.442695, %v1865_v36  ;;  %v3087_v38 = vpop.f32.mrb[15].mxu0 }
 0xa24   : > { %3430 = vpow2.f32 %v2816_v37 }
 0xa2c   : > { %v3429_v39 = vpop.eup %3428 }
 0xa2d   : > { %v1875_v40 = vadd.f32 1.0, %v3429_v39 }
 0xa2e   : > { %v3431_v41 = vpop.eup %3430 }
 0xa2f   : > { %3432 = vrcp.f32 %v1875_v40  ;;  %v1876_v42 = vadd.f32 1.0, %v3431_v41 }
 0xa31   : > { %3434 = vrcp.f32 %v1876_v42 }
 0xa39   : > { %v3433_v43 = vpop.eup %3432 }
 0xa3a   : > { %v1881_v45 = vmul.f32 %v3433_v43, %v1862_v34 }
 0xa3b   : > { %v3435_v44 = vpop.eup %3434 }
 0xa3c   : > { %v1882_v46 = vmul.f32 %v3435_v44, %v1865_v36 }
 0xa3e   : > { %v1883_v47 = vpack.c.bf16 %v1882_v46, %v1881_v45 }
 0xa40   : > { %3105 = vmatmul.mubr.bf16.vlgmr.msra.gmra.mrb[12].mxu1 %v1883_v47 }
 0xa41   : > { %3144 = vmatprep.mubr.msk.bf16.mxu1 %vm3947_vm0, %v3946_v5  ;;  %3129 = vmatpush3.bf16.msra.mxu1 %v3404_v49 }
 0xa42   : > { %3130 = vmatprep.subr.bf16.mxu1 %v3946_v5 }
 0xa45   : > { %3131 = vmatpush3.bf16.msra.mxu1 %v3405_v50 }
 0xa46   : > { %3132 = vmatprep.subr.bf16.mxu1 %v3946_v5 }
 0xa49   : > { %3133 = vmatpush3.bf16.msra.mxu1 %v3406_v51 }
 0xa4a   : > { %3134 = vmatprep.subr.bf16.mxu1 %v3946_v5 }
 0xa4d   : > { %3135 = vmatpush3.bf16.msra.mxu1 %v3407_v52 }
 0xa4e   : > { %3136 = vmatprep.subr.bf16.mxu1 %v3946_v5 }
 0xa51   : > { %3137 = vmatpush3.bf16.msra.mxu1 %v3408_v53 }
 0xa52   : > { %3138 = vmatprep.subr.bf16.mxu1 %v3946_v5 }
 0xa55   : > { %3139 = vmatpush3.bf16.msra.mxu1 %v3409_v54 }
 0xa56   : > { %3140 = vmatprep.subr.bf16.mxu1 %v3946_v5 }
 0xa59   : > { %3141 = vmatpush3.bf16.msra.mxu1 %v3410_v55 }
 0xa5a   : > { %3142 = vmatprep.subr.bf16.mxu1 %v3946_v5 }
 0xa5d   : > { %3143 = vmatpush3.bf16.msra.mxu1 %v3411_v61 }
 0xb13   : > { %v1982_v56 = vpop.f32.mrb[12].mxu1 }
 0xb14   : > { %v3106_v57 = vpop.f32.mrb[13].mxu1 }
 0xb15   : > { %v1985_v58 = vpop.f32.mrb[14].mxu1 }
 0xb16   : > { %v1989_v59 = vpack.c.bf16 %v1985_v58, %v1982_v56  ;;  %v3107_v60 = vpop.f32.mrb[15].mxu1 }
 0xb18   : > { %3125 = vmatmul.mubr.bf16.vlgmr.msra.gmra.mrb[16].mxu0 %v1989_v59 }
 0xb19   : > { %3164 = vmatprep.mubr.msk.bf16.mxu0 %vm3947_vm0, %v3946_v5  ;;  %3149 = vmatpush3.bf16.msra.mxu0 %v3412_v62 }
 0xb1a   : > { %3150 = vmatprep.subr.bf16.mxu0 %v3946_v5 }
 0xb1d   : > { %3151 = vmatpush3.bf16.msra.mxu0 %v3413_v63 }
 0xb1e   : > { %3152 = vmatprep.subr.bf16.mxu0 %v3946_v5 }
 0xb21   : > { %3153 = vmatpush3.bf16.msra.mxu0 %v3414_v0 }
 0xb22   : > { %3154 = vmatprep.subr.bf16.mxu0 %v3946_v5 }
 0xb25   : > { %3155 = vmatpush3.bf16.msra.mxu0 %v3415_v1 }
 0xb26   : > { %3156 = vmatprep.subr.bf16.mxu0 %v3946_v5 }
 0xb29   : > { %3157 = vmatpush3.bf16.msra.mxu0 %v3416_v4 }
 0xb2a   : > { %3158 = vmatprep.subr.bf16.mxu0 %v3946_v5 }
 0xb2d   : > { %3159 = vmatpush3.bf16.msra.mxu0 %v3417_v6 }
 0xb2e   : > { %3160 = vmatprep.subr.bf16.mxu0 %v3946_v5 }
 0xb31   : > { %3161 = vmatpush3.bf16.msra.mxu0 %v3418_v7 }
 0xb32   : > { %3162 = vmatprep.subr.bf16.mxu0 %v3946_v5 }
 0xb35   : > { %3163 = vmatpush3.bf16.msra.mxu0 %v3419_v14 }
 0xbeb   : > { %v2088_v9 = vpop.f32.mrb[16].mxu0 }
 0xbec   : > { %v3126_v10 = vpop.f32.mrb[17].mxu0 }
 0xbed   : > { %v2091_v11 = vpop.f32.mrb[18].mxu0 }
 0xbee   : > { %v2095_v12 = vpack.c.bf16 %v2091_v11, %v2088_v9  ;;  %v3127_v13 = vpop.f32.mrb[19].mxu0 }
 0xbf0   : > { %3145 = vmatmul.mubr.bf16.vlgmr.msra.gmra.mrb[16].mxu1 %v2095_v12 }
 0xcc3   : > { %v2194_v15 = vpop.f32.mrb[16].mxu1 }
 0xcc4   : > { %v3146_v16 = vpop.f32.mrb[17].mxu1 }
 0xcc5   : > { %v2197_v17 = vpop.f32.mrb[18].mxu1 }
 0xcc6   : > { %v2201_v18 = vpack.c.bf16 %v2197_v17, %v2194_v15  ;;  %v3147_v19 = vpop.f32.mrb[19].mxu1 }
 0xcc8   : > { %3165 = vmatmul.mubr.bf16.vlgmr.msra.gmra.mrb[20].mxu0 %v2201_v18 }
 0xd98   : > { %2312 = sbr.rel (%p2849_p13) target bundleno = 3489 (0xda1), region = 152 }
 0xd9b   : > { %v2300_v20 = vpop.f32.mrb[20].mxu0 }
 0xd9c   : > { %v2307_v21 = vadd.f32 %v2300_v20, %v4798_v27  ;;  %v3166_v22 = vpop.f32.mrb[21].mxu0 }
 0xd9d   : > { %v2303_v23 = vpop.f32.mrb[22].mxu0 }
 0xd9e   : > { %v2308_v5 = vadd.f32 %v2303_v23, %v4801_v30  ;;  %v3167_v24 = vpop.f32.mrb[23].mxu0  ;;  %2313 = vst [vmem:[%s4684_s14] sm:$0xff] (!%p2849_p13), %v2307_v21 }
 0xda0   : > { %2314 = vst [vmem:[%s4684_s14 + $0x8] sm:$0xff] %v2308_v5 }
 0xda1 PF: > { %s5141_s5 = sld [smem:[#allocation25_spill]] }
 0xda7   : > { %p2850_p0 = scmp.ne.s32.totalorder %s5141_s5, 1 }
 0xda8   : > { %2321 = vadd.xlane.f32.xlu0 (!%p2850_p0), %v2307_v21  ;;  %s5142_s11 = sld [smem:[#allocation49_spill]] (!%p2850_p0)  ;;  %s5143_s27 = sld [smem:[#allocation50_spill]] (!%p2850_p0) }
 0xda9   : > { %2318 = sbr.rel (%p2850_p0) target bundleno = 3814 (0xee6), region = 156 }
 0xdac   : > { %2323 = vadd.xlane.f32.xlu0 (!%p2850_p0), %v2308_v5 }
 0xdae   : > { %v2851_v40 = vld [vmem:[%s5142_s11] ss:$0 sm:$0xff] (!%p2850_p0) }
 0xe35   : > { %v2322_v25 = vpop.xlane.xlu0 %2321 }
 0xe36   : > { %v2325_v27 = vmul.f32 0.020833334, %v2322_v25 }
 0xe38   : > { %v2327_v26 = vsub.f32 %v2307_v21, %v2325_v27 }
 0xe39   : > { %v2324_v28 = vpop.xlane.xlu0 %2323 }
 0xe3a   : > { %v2329_v30 = vmul.f32 %v4704_v8, %v2327_v26  ;;  %v2326_v29 = vmul.f32 0.020833334, %v2324_v28 }
 0xe3c   : > { %v2328_v31 = vsub.f32 %v2308_v5, %v2326_v29  ;;  %v2331_v32 = vmul.f32 %v2329_v30, %v2329_v30 }
 0xe3e   : > { %v2330_v33 = vmul.f32 %v4704_v8, %v2328_v31  ;;  %2333 = vadd.xlane.f32.xlu1 %v2331_v32  ;;  %v2852_v8 = vld [vmem:[%s5143_s27] ss:$0 sm:$0xff] }
 0xe40   : > { %v2332_v2 = vmul.f32 %v2330_v33, %v2330_v33 }
 0xe42   : > { %2335 = vadd.xlane.f32.xlu1 %v2332_v2 }
 0xecb   : > { %v2334_v34 = vpop.xlane.xlu1 %2333 }
 0xecc   : > { %v2337_v35 = vmul.f32 0.020833334, %v2334_v34 }
 0xece   : > { %v2339_v3 = vadd.f32 1e-05, %v2337_v35 }
 0xecf   : > { %v2336_v36 = vpop.xlane.xlu1 %2335 }
 0xed0   : > { %3436 = vrsqrt.f32 %v2339_v3  ;;  %v2338_v37 = vmul.f32 0.020833334, %v2336_v36 }
 0xed2   : > { %v2340_v38 = vadd.f32 1e-05, %v2338_v37 }
 0xed4   : > { %3438 = vrsqrt.f32 %v2340_v38 }
 0xeda   : > { %v3437_v39 = vpop.eup %3436 }
 0xedb   : > { %v2343_v41 = vmul.f32 %v3437_v39, %v2329_v30 }
 0xedd   : > { %v2351_v42 = vmul.f32 %v2851_v40, %v2343_v41 }
 0xede   : > { %v3439_v43 = vpop.eup %3438 }
 0xedf   : > { %v2359_v44 = vadd.f32 %v2852_v8, %v2351_v42  ;;  %v2344_v45 = vmul.f32 %v3439_v43, %v2330_v33 }
 0xee1   : > { %2361 = vst [vmem:[%s4684_s14] sm:$0xff] %v2359_v44  ;;  %v2352_v46 = vmul.f32 %v2851_v40, %v2344_v45 }
 0xee3   : > { %v2360_v47 = vadd.f32 %v2852_v8, %v2352_v46 }
 0xee5   : > { %2362 = vst [vmem:[%s4684_s14 + $0x8] sm:$0xff] %v2360_v47 }
 0xee6 PF: > { %s5144_s19 = sld [smem:[#allocation26_spill]]  ;;  %s5146_s10 = sld [smem:[#allocation51_spill]] }
 0xee7   : > { %s5145_s17 = sld [smem:[#allocation24_spill]]  ;;  %s2377_s12 = sshll.u32 %s4684_s14, 4  ;;  %s4944_s12 = int_to_ptr.vmem [resolvable:$true] %s2377_s12 }
 0xee8   : > { %s3798_s26 = scalar_lea.vmem %s4944_s12, 256  ;;  %p5148_p6 = scmp.ne.s32.totalorder %s5113_s23, 0 }
 0xee9   : > { %p3799_p5 = scmp.ne.s32.totalorder %s4944_s12, %s3798_s26  ;;  %s3948_s7 = smov [#allocation17]  }
 0xeea   : > { %s3802_s13 = sshll.u32 %s3948_s7, 4  ;;  %s3803_s13 = int_to_ptr.vmem [resolvable:$false] %s3802_s13 }
 0xeeb   : > { %p3800_p4 = pnand %p3799_p5, %p5148_p6  ;;  %s3804_s0 = scalar_lea.vmem %s3803_s13, 512 }
 0xeec   : > { %s2869_s30 = sshll.u32 %s5144_s19, 8  ;;  %p3805_p12 = scmp.lt.s32.totalorder %s4944_s12, %s3803_s13 }
 0xeed   : > { %s4941_s2 = scalar_lea.hbm %s5146_s10, %s2869_s30  ;;  %s5147_s16 = sand.u32 1, %s5145_s17  }
 0xeee   : > { %s4948_s24 = scalar_lea.sflag [#allocation4], %s5147_s16  ;;  %p3801_p1 = pneg %p3800_p4 }
 0xeef   : > { %p3806_p9 = scmp.lt.s32.totalorder %s3804_s0, %s3798_s26 }
 0xef1   : > { %p3807_p7 = por %p3806_p9, %p3805_p12 }
 0xef3   : > { %p3808_p10 = pnand %p3807_p7, %p3801_p1 }
 0xef5   : > { %3811 = shalt.err (!%p3808_p10)
}
 0xef6   : > { %s3812_s14 = scalar_lea.hbm %s4941_s2, 256  ;;  %s3816_s5 = scalar_lea.hbm %s5146_s10, 512 }
 0xef7   : > { %p3813_p8 = scmp.ne.s32.totalorder %s4941_s2, %s3812_s14  ;;  %p3817_p3 = scmp.lt.u32.totalorder %s4941_s2, %s5146_s10 }
 0xef8   : > { %p3818_p13 = scmp.lt.u32.totalorder %s3816_s5, %s3812_s14  ;;  %p3820_p5 = scmp.lt.u32.totalorder %s3812_s14, %s4941_s2 }
 0xef9   : > { %p3814_p11 = pnand %p3813_p8, %p5148_p6 }
 0xefa   : > { %p3819_p0 = por %p3818_p13, %p3817_p3 }
 0xefb   : > { %p3815_p2 = pneg %p3814_p11 }
 0xefc   : > { %p3821_p4 = por %p3820_p5, %p3819_p0 }
 0xefe   : > { %p3822_p1 = pnand %p3821_p4, %p3815_p2 }
 0xf00   : > { %3825 = shalt.err (!%p3822_p1)
}
 0xf01   : > { %s3949_s11 = smov 128   ;;  %s3950_s28 = smov 8  }
 0xf02   : > { %3194 = dma.vmem_to_hbm [thread:$0]  (%p5148_p6), %s4944_s12, 256, %s4941_s2, %s4948_s24, %s3949_s11, %s3949_s11, %s3950_s28  }
 0xf03 PF: > { %p3241_p12 = scmp.ge.s32.totalorder %s3928_s3, 2  ;;  %s2392_s4 = sand.u32 1, %s3900_s21  }
 0xf04   : > { %p5149_p9 = scmp.ne.s32.totalorder %s5114_s15, 0  ;;  %s2393_s27 = scalar_lea.sflag [#allocation4], %s2392_s4 }
 0xf06   : > { %p3235_p7 = pnand %p3241_p12, %p5149_p9 }
 0xf08   : > { %3883 = dma.done.wait (!%p3235_p7), %s2393_s27, 256  }
 0xf09   : > { %3885 = vsyncadd (!%p3235_p7), %s2393_s27, 4294967040  ;;  %s36_s3 = sadd.s32 1, %s3928_s3   ;;  %s5150_s0 = sld [smem:[#allocation23_spill]] }
 0xf0a   : > { %p33_p10 = scmp.ge.s32.totalorder %s36_s3, 6   ;;  %s5151_s21 = sld [smem:[#allocation24_spill]] }
 0xf0b   : > { %s5152_s23 = sld [smem:[#allocation31_spill]]  ;;  %s5153_s2 = sld [smem:[#allocation27_spill]] }
 0xf0c   : > { %s5154_s19 = sld [smem:[#allocation28_spill]]  ;;  %s5155_s24 = sld [smem:[#allocation29_spill]] }
 0xf0d   : > { %s5156_s25 = sld [smem:[#allocation30_spill]]  ;;  %s5157_s30 = smov %s3896_s20 }
 0xf0e   : > { %s5158_s20 = smov %s4130_s18  ;;  %s5159_s1 = smov %s3908_s22 }
 0xf0f   :  { %35 = sbr.rel (!%p33_p10) target bundleno = 31 (0x1f), region = 279 }
 0xf11   : > { %s5160_s22 = smov %s5152_s23 }
 0xf12   : > { %s5161_s23 = smov %s5154_s19 }
 0xf16   :  { %2398 = vsyncpa [#allocation3], 1 }
 0xf17   :  { %2400 = vsyncpa [#allocation3 + $0x1], 1 }
 0xf18   :  { %2401 = vsyncpa [#allocation6], 1 }
 0xf19   :  { %2402 = vsyncpa [#allocation4], 1 }
 0xf1a   :  { %2404 = vsyncpa [#allocation4 + $0x1], 1 }

</bundles_post_ra>
